<compile_context>
chip_gen: v7x
topology: tpu7x:2x2x1
jax: 0.10.0
libtpu: 0.0.40
codegen_flags: <defaults>
</compile_context>

<pallas_src>
import functools

import jax
import jax.numpy as jnp
import numpy as np
from jax.experimental import pallas as pl
from jax.experimental.pallas import tpu as pltpu


# -----------------------------------------------------------------------------
# Fused whole-network kernel (one batch element per grid step)
# -----------------------------------------------------------------------------
def _tcn_fused_kernel(x_ref, *refs, layers, T, k):
    """All TemporalBlocks + final Linear, entirely in VMEM."""
    n_w = sum(6 if L["down"] else 4 for L in layers) + 2
    w_refs = refs[:n_w]
    out_ref = refs[n_w]
    act_ref = refs[n_w + 1]   # (R + T, c_scr) f32: padded input of current layer
    hid_ref = refs[n_w + 2]   # (R + T, c_scr) f32: padded relu(conv1) activation
    c_scr = act_ref.shape[1]
    R = act_ref.shape[0] - T  # aligned pad region, R >= max (k-1)*d, R % 8 == 0

    # Zero the causal-pad region once (aligned full-width stores).
    if R > 0:
        zeros_pad = jnp.zeros((R, c_scr), jnp.float32)
        act_ref[0:R, :] = zeros_pad
        hid_ref[0:R, :] = zeros_pad

    # Stage layer-0 input at a sublane-aligned offset (no wrapper jnp.pad).
    c0 = layers[0]["in_c"]
    act_ref[R:R + T, 0:c0] = x_ref[0]

    wi = 0
    h_last = None
    for li, L in enumerate(layers):
        d, p, in_c, out_c = L["d"], L["p"], L["in_c"], L["out_c"]
        w1_ref, b1_ref, w2_ref, b2_ref = w_refs[wi:wi + 4]
        wi += 4
        if L["down"]:
            wd_ref, bd_ref = w_refs[wi:wi + 2]
            wi += 2

        x_in = act_ref[R:R + T, 0:in_c]                 # (T, in_c) f32 input

        # ---- conv1 (causal, dilated) + bias + ReLU ---------------------------
        # Tap reads start at R - p + j*d (not sublane aligned); accepted at
        # these sizes — an im2col restructuring would trade alignment for
        # extra copies with tiny channel counts.
        acc1 = jnp.zeros((T, out_c), jnp.float32)
        for j in range(k):                               # static unroll
            s = R - p + j * d
            acc1 += jnp.dot(act_ref[s:s + T, 0:in_c].astype(jnp.bfloat16),
                            w1_ref[j],                   # bf16 weights
                            preferred_element_type=jnp.float32)
        h1 = jnp.maximum(acc1 + b1_ref[...], 0.0)        # (T, out_c) f32

        # ---- conv2 on left-zero-padded h1 (padding via VMEM scratch) ---------
        hid_ref[R:R + T, 0:out_c] = h1                   # aligned store
        acc2 = jnp.zeros((T, out_c), jnp.float32)
        for j in range(k):
            s = R - p + j * d
            acc2 += jnp.dot(hid_ref[s:s + T, 0:out_c].astype(jnp.bfloat16),
                            w2_ref[j],
                            preferred_element_type=jnp.float32)
        h2 = jnp.maximum(acc2 + b2_ref[...], 0.0)        # ReLU after conv2

        # ---- residual: 1x1 conv when channels change, plain add otherwise ----
        if L["down"]:
            res = jnp.dot(x_in.astype(jnp.bfloat16), wd_ref[...],
                          preferred_element_type=jnp.float32) + bd_ref[...]
        else:
            res = x_in                                   # identity path, f32
        out = jnp.maximum(h2 + res, 0.0)                 # (T, out_c) f32

        if li + 1 < len(layers):
            act_ref[R:R + T, 0:out_c] = out              # next layer's input
        else:
            h_last = out[T - 1:T, :]                     # (1, out_c) last step

    # ---- final Linear on the last timestep (fused, no separate launch) -------
    wl_ref, bl_ref = w_refs[n_w - 2], w_refs[n_w - 1]
    y = jnp.dot(h_last.astype(jnp.bfloat16), wl_ref[...],
                preferred_element_type=jnp.float32) + bl_ref[...]
    out_ref[0] = y


# -----------------------------------------------------------------------------
# Wrapper: flatten params, build BlockSpecs, one pallas_call for the whole net
# -----------------------------------------------------------------------------
def tcn_forward(x, params):
    """x: (B, T, input_size) f32 -> (B, output_size) f32."""
    B, T, c_in = x.shape
    blocks = params["blocks"]
    k = blocks[0]["k"]
    out_size = params["wl"].shape[-1]

    layers, weights = [], []
    for blk in blocks:
        d = blk["dilation"]
        p = (k - 1) * d
        in_c, out_c = blk["w1"].shape[1], blk["w1"].shape[2]
        down = blk["wd"] is not None
        layers.append(dict(d=d, p=p, in_c=in_c, out_c=out_c, down=down))
        weights += [blk["w1"], blk["b1"], blk["w2"], blk["b2"]]
        if down:
            weights += [blk["wd"], blk["bd"]]
    weights += [params["wl"], params["bl"]]

    p_max = max(L["p"] for L in layers)
    R = ((p_max + 7) // 8) * 8                 # sublane-aligned pad region
    c_scr = max([c_in] + [L["out_c"] for L in layers])

    in_specs = [pl.BlockSpec((1, T, c_in), lambda b: (b, 0, 0))]
    for w in weights:                          # whole-array, VMEM-resident
        in_specs.append(pl.BlockSpec(w.shape, lambda b, nd=w.ndim: (0,) * nd))

    kernel = functools.partial(_tcn_fused_kernel, layers=layers, T=T, k=k)
    y = pl.pallas_call(
        kernel,
        out_shape=jax.ShapeDtypeStruct((B, 1, out_size), jnp.float32),
        grid=(B,),
        in_specs=in_specs,
        out_specs=pl.BlockSpec((1, 1, out_size), lambda b: (b, 0, 0)),
        scratch_shapes=[pltpu.VMEM((R + T, c_scr), jnp.float32),
                        pltpu.VMEM((R + T, c_scr), jnp.float32)],
        compiler_params=pltpu.CompilerParams(
            dimension_semantics=("parallel",)),   # batch axis -> both v7x TCs
    )(x, *weights)
    return y[:, 0, :]


# -----------------------------------------------------------------------------
# Deterministic parameters (matches the module's __init__ / init_weights):
# conv weights kaiming-normal (fan_in, gain sqrt(2)), conv biases zeroed,
# Linear default uniform init.  Conv weights stored as (k, C_in, C_out), i.e.
# W_torch[:, :, j].T per tap j.  Matmul weights are kept in bf16.
# -----------------------------------------------------------------------------
def make_params(key, input_size, output_size, num_channels, kernel_size):
    blocks = []
    in_c = input_size
    for i, out_c in enumerate(num_channels):
        d = 2 ** i
        key, k1, k2, k3 = jax.random.split(key, 4)
        std1 = (2.0 / (in_c * kernel_size)) ** 0.5
        std2 = (2.0 / (out_c * kernel_size)) ** 0.5
        w1 = (jax.random.normal(k1, (kernel_size, in_c, out_c), jnp.float32)
              * std1).astype(jnp.bfloat16)
        w2 = (jax.random.normal(k2, (kernel_size, out_c, out_c), jnp.float32)
              * std2).astype(jnp.bfloat16)
        if in_c != out_c:
            stdd = (2.0 / in_c) ** 0.5
            wd = (jax.random.normal(k3, (in_c, out_c), jnp.float32)
                  * stdd).astype(jnp.bfloat16)
            bd = jnp.zeros((1, out_c), jnp.float32)
        else:
            wd, bd = None, None          # no downsample -> identity residual
        blocks.append(dict(
            w1=w1, b1=jnp.zeros((1, out_c), jnp.float32),
            w2=w2, b2=jnp.zeros((1, out_c), jnp.float32),
            wd=wd, bd=bd, dilation=d, k=kernel_size))
        in_c = out_c
    key, kl, kb = jax.random.split(key, 3)
    bound = 1.0 / (in_c ** 0.5)
    wl = jax.random.uniform(kl, (in_c, output_size), jnp.float32,
                            -bound, bound).astype(jnp.bfloat16)
    bl = jax.random.uniform(kb, (1, output_size), jnp.float32, -bound, bound)
    return dict(blocks=blocks, wl=wl, bl=bl)


# -----------------------------------------------------------------------------
# Pure-JAX reference implementing the same math (bf16 matmul inputs, f32
# accumulation).  The f32 PyTorch module differs only by bf16 input rounding.
# -----------------------------------------------------------------------------
def _ref_forward(x, params):
    h = x
    for blk in params["blocks"]:
        d, k = blk["dilation"], blk["k"]
        p = (k - 1) * d
        T = h.shape[1]
        hp = jnp.pad(h, ((0, 0), (p, 0), (0, 0)))
        acc1 = sum(jnp.einsum("btc,cd->btd",
                              hp[:, j * d:j * d + T, :].astype(jnp.bfloat16),
                              blk["w1"][j],
                              preferred_element_type=jnp.float32)
                   for j in range(k)) + blk["b1"]
        h1 = jnp.maximum(acc1, 0.0)
        h1p = jnp.pad(h1, ((0, 0), (p, 0), (0, 0)))
        acc2 = sum(jnp.einsum("btc,cd->btd",
                              h1p[:, j * d:j * d + T, :].astype(jnp.bfloat16),
                              blk["w2"][j],
                              preferred_element_type=jnp.float32)
                   for j in range(k)) + blk["b2"]
        h2 = jnp.maximum(acc2, 0.0)
        if blk["wd"] is not None:
            res = jnp.einsum("btc,cd->btd", h.astype(jnp.bfloat16), blk["wd"],
                             preferred_element_type=jnp.float32) + blk["bd"]
        else:
            res = h
        h = jnp.maximum(h2 + res, 0.0)
    last = h[:, -1, :]
    return (jnp.dot(last.astype(jnp.bfloat16), params["wl"],
                    preferred_element_type=jnp.float32) + params["bl"])


if __name__ == "__main__":
    input_size, output_size = 4, 3
    num_channels = [16, 32, 32]   # last block exercises the identity residual
    kernel_size = 3
    B, T = 2, 16

    key = jax.random.PRNGKey(0)
    kp, kx = jax.random.split(key)
    params = make_params(kp, input_size, output_size, num_channels, kernel_size)
    # input: (batch, time, features) — same as the PyTorch module's input
    x = jax.random.normal(kx, (B, T, input_size), jnp.float32)

    y = tcn_forward(x, params)
    jax.block_until_ready(y)
    assert y.shape == (B, output_size)

    y_ref = _ref_forward(x, params)
    np.testing.assert_allclose(np.asarray(y), np.asarray(y_ref),
                               rtol=2e-3, atol=2e-3)
    print("KERNEL_OK")
</pallas_src>

<mosaic_0001>
module attributes {stable_mosaic.version = 11 : i64} {
  func.func @_tcn_fused_kernel(%arg0: i32, %arg1: memref<1x16x4xf32, #tpu.memory_space<vmem>>, %arg2: memref<3x4x16xbf16, #tpu.memory_space<vmem>>, %arg3: memref<1x16xf32, #tpu.memory_space<vmem>>, %arg4: memref<3x16x16xbf16, #tpu.memory_space<vmem>>, %arg5: memref<1x16xf32, #tpu.memory_space<vmem>>, %arg6: memref<4x16xbf16, #tpu.memory_space<vmem>>, %arg7: memref<1x16xf32, #tpu.memory_space<vmem>>, %arg8: memref<3x16x32xbf16, #tpu.memory_space<vmem>>, %arg9: memref<1x32xf32, #tpu.memory_space<vmem>>, %arg10: memref<3x32x32xbf16, #tpu.memory_space<vmem>>, %arg11: memref<1x32xf32, #tpu.memory_space<vmem>>, %arg12: memref<16x32xbf16, #tpu.memory_space<vmem>>, %arg13: memref<1x32xf32, #tpu.memory_space<vmem>>, %arg14: memref<3x32x32xbf16, #tpu.memory_space<vmem>>, %arg15: memref<1x32xf32, #tpu.memory_space<vmem>>, %arg16: memref<3x32x32xbf16, #tpu.memory_space<vmem>>, %arg17: memref<1x32xf32, #tpu.memory_space<vmem>>, %arg18: memref<32x3xbf16, #tpu.memory_space<vmem>>, %arg19: memref<1x3xf32, #tpu.memory_space<vmem>>, %arg20: memref<1x1x3xf32, #tpu.memory_space<vmem>>, %arg21: memref<24x32xf32, #tpu.memory_space<vmem>>, %arg22: memref<24x32xf32, #tpu.memory_space<vmem>>) attributes {dimension_semantics = [#tpu.dimension_semantics<parallel>], iteration_bounds = array<i64: 2>, scalar_prefetch = 0 : i64, scratch_operands = 2 : i64, tpu.core_type = #tpu.core_type<tc>, window_params = [{transform_indices = @transform_0, window_bounds = array<i64: 1, 16, 4>}, {pipeline_mode = #tpu.pipeline_mode<synchronous>, transform_indices = @transform_1, window_bounds = array<i64: 3, 4, 16>}, {pipeline_mode = #tpu.pipeline_mode<synchronous>, transform_indices = @transform_2, window_bounds = array<i64: 1, 16>}, {pipeline_mode = #tpu.pipeline_mode<synchronous>, transform_indices = @transform_3, window_bounds = array<i64: 3, 16, 16>}, {pipeline_mode = #tpu.pipeline_mode<synchronous>, transform_indices = @transform_4, window_bounds = array<i64: 1, 16>}, {pipeline_mode = #tpu.pipeline_mode<synchronous>, transform_indices = @transform_5, window_bounds = array<i64: 4, 16>}, {pipeline_mode = #tpu.pipeline_mode<synchronous>, transform_indices = @transform_6, window_bounds = array<i64: 1, 16>}, {pipeline_mode = #tpu.pipeline_mode<synchronous>, transform_indices = @transform_7, window_bounds = array<i64: 3, 16, 32>}, {pipeline_mode = #tpu.pipeline_mode<synchronous>, transform_indices = @transform_8, window_bounds = array<i64: 1, 32>}, {pipeline_mode = #tpu.pipeline_mode<synchronous>, transform_indices = @transform_9, window_bounds = array<i64: 3, 32, 32>}, {pipeline_mode = #tpu.pipeline_mode<synchronous>, transform_indices = @transform_10, window_bounds = array<i64: 1, 32>}, {pipeline_mode = #tpu.pipeline_mode<synchronous>, transform_indices = @transform_11, window_bounds = array<i64: 16, 32>}, {pipeline_mode = #tpu.pipeline_mode<synchronous>, transform_indices = @transform_12, window_bounds = array<i64: 1, 32>}, {pipeline_mode = #tpu.pipeline_mode<synchronous>, transform_indices = @transform_13, window_bounds = array<i64: 3, 32, 32>}, {pipeline_mode = #tpu.pipeline_mode<synchronous>, transform_indices = @transform_14, window_bounds = array<i64: 1, 32>}, {pipeline_mode = #tpu.pipeline_mode<synchronous>, transform_indices = @transform_15, window_bounds = array<i64: 3, 32, 32>}, {pipeline_mode = #tpu.pipeline_mode<synchronous>, transform_indices = @transform_16, window_bounds = array<i64: 1, 32>}, {pipeline_mode = #tpu.pipeline_mode<synchronous>, transform_indices = @transform_17, window_bounds = array<i64: 32, 3>}, {pipeline_mode = #tpu.pipeline_mode<synchronous>, transform_indices = @transform_18, window_bounds = array<i64: 1, 3>}, {transform_indices = @transform_19, window_bounds = array<i64: 1, 1, 3>}]} {
    %cst = arith.constant 0.000000e+00 : f32
    %0 = vector.broadcast %cst : f32 to vector<8x32xf32>
    %c0 = arith.constant 0 : index
    %c0_0 = arith.constant 0 : index
    %1 = vector.load %arg21[%c0, %c0_0] : memref<24x32xf32, #tpu.memory_space<vmem>>, vector<8x32xf32>
    tpu.vector_store %arg21[%c0, %c0_0], %0 {strides = array<i32>} : memref<24x32xf32, #tpu.memory_space<vmem>>, vector<8x32xf32>,
    %c0_1 = arith.constant 0 : index
    %c0_2 = arith.constant 0 : index
    %2 = vector.load %arg22[%c0_1, %c0_2] : memref<24x32xf32, #tpu.memory_space<vmem>>, vector<8x32xf32>
    tpu.vector_store %arg22[%c0_1, %c0_2], %0 {strides = array<i32>} : memref<24x32xf32, #tpu.memory_space<vmem>>, vector<8x32xf32>,
    %c0_3 = arith.constant 0 : index
    %c0_4 = arith.constant 0 : index
    %c0_5 = arith.constant 0 : index
    %3 = vector.load %arg1[%c0_3, %c0_4, %c0_5] : memref<1x16x4xf32, #tpu.memory_space<vmem>>, vector<1x16x4xf32>
    %4 = vector.shape_cast %3 : vector<1x16x4xf32> to vector<16x4xf32>
    %c8 = arith.constant 8 : index
    %c0_6 = arith.constant 0 : index
    %5 = vector.load %arg21[%c8, %c0_6] : memref<24x32xf32, #tpu.memory_space<vmem>>, vector<16x4xf32>
    tpu.vector_store %arg21[%c8, %c0_6], %4 {strides = array<i32>} : memref<24x32xf32, #tpu.memory_space<vmem>>, vector<16x4xf32>,
    %c8_7 = arith.constant 8 : index
    %c0_8 = arith.constant 0 : index
    %6 = vector.load %arg21[%c8_7, %c0_8] : memref<24x32xf32, #tpu.memory_space<vmem>>, vector<16x4xf32>
    %cst_9 = arith.constant 0.000000e+00 : f32
    %7 = vector.broadcast %cst_9 : f32 to vector<16x16xf32>
    %c6 = arith.constant 6 : index
    %c0_10 = arith.constant 0 : index
    %8 = vector.load %arg21[%c6, %c0_10] : memref<24x32xf32, #tpu.memory_space<vmem>>, vector<16x4xf32>
    %9 = arith.truncf %8 : vector<16x4xf32> to vector<16x4xbf16>
    %c0_11 = arith.constant 0 : index
    %c0_12 = arith.constant 0 : index
    %c0_13 = arith.constant 0 : index
    %10 = vector.load %arg2[%c0_11, %c0_12, %c0_13] : memref<3x4x16xbf16, #tpu.memory_space<vmem>>, vector<1x4x16xbf16>
    %11 = vector.shape_cast %10 : vector<1x4x16xbf16> to vector<4x16xbf16>
    %cst_14 = arith.constant dense<0.000000e+00> : vector<16x16xf32>
    %12 = tpu.matmul %9, %11, %cst_14 {dimension_numbers = #tpu.dot_dimension_numbers<[1], [0], [0], [1], [0, 0, 1, 1], [], []>} : vector<16x4xbf16>, vector<4x16xbf16>, vector<16x16xf32> -> vector<16x16xf32>
    %13 = arith.addf %7, %12 : vector<16x16xf32>
    %c7 = arith.constant 7 : index
    %c0_15 = arith.constant 0 : index
    %14 = vector.load %arg21[%c7, %c0_15] : memref<24x32xf32, #tpu.memory_space<vmem>>, vector<16x4xf32>
    %15 = arith.truncf %14 : vector<16x4xf32> to vector<16x4xbf16>
    %c1 = arith.constant 1 : index
    %c0_16 = arith.constant 0 : index
    %c0_17 = arith.constant 0 : index
    %16 = vector.load %arg2[%c1, %c0_16, %c0_17] : memref<3x4x16xbf16, #tpu.memory_space<vmem>>, vector<1x4x16xbf16>
    %17 = vector.shape_cast %16 : vector<1x4x16xbf16> to vector<4x16xbf16>
    %cst_18 = arith.constant dense<0.000000e+00> : vector<16x16xf32>
    %18 = tpu.matmul %15, %17, %cst_18 {dimension_numbers = #tpu.dot_dimension_numbers<[1], [0], [0], [1], [0, 0, 1, 1], [], []>} : vector<16x4xbf16>, vector<4x16xbf16>, vector<16x16xf32> -> vector<16x16xf32>
    %19 = arith.addf %13, %18 : vector<16x16xf32>
    %c8_19 = arith.constant 8 : index
    %c0_20 = arith.constant 0 : index
    %20 = vector.load %arg21[%c8_19, %c0_20] : memref<24x32xf32, #tpu.memory_space<vmem>>, vector<16x4xf32>
    %21 = arith.truncf %20 : vector<16x4xf32> to vector<16x4xbf16>
    %c2 = arith.constant 2 : index
    %c0_21 = arith.constant 0 : index
    %c0_22 = arith.constant 0 : index
    %22 = vector.load %arg2[%c2, %c0_21, %c0_22] : memref<3x4x16xbf16, #tpu.memory_space<vmem>>, vector<1x4x16xbf16>
    %23 = vector.shape_cast %22 : vector<1x4x16xbf16> to vector<4x16xbf16>
    %cst_23 = arith.constant dense<0.000000e+00> : vector<16x16xf32>
    %24 = tpu.matmul %21, %23, %cst_23 {dimension_numbers = #tpu.dot_dimension_numbers<[1], [0], [0], [1], [0, 0, 1, 1], [], []>} : vector<16x4xbf16>, vector<4x16xbf16>, vector<16x16xf32> -> vector<16x16xf32>
    %25 = arith.addf %19, %24 : vector<16x16xf32>
    %c0_24 = arith.constant 0 : index
    %c0_25 = arith.constant 0 : index
    %26 = vector.load %arg3[%c0_24, %c0_25] : memref<1x16xf32, #tpu.memory_space<vmem>>, vector<1x16xf32>
    %27 = vector.broadcast %26 : vector<1x16xf32> to vector<16x16xf32>
    %28 = arith.addf %25, %27 : vector<16x16xf32>
    %cst_26 = arith.constant 0.000000e+00 : f32
    %29 = vector.broadcast %cst_26 : f32 to vector<16x16xf32>
    %30 = arith.maximumf %28, %29 : vector<16x16xf32>
    %c8_27 = arith.constant 8 : index
    %c0_28 = arith.constant 0 : index
    %31 = vector.load %arg22[%c8_27, %c0_28] : memref<24x32xf32, #tpu.memory_space<vmem>>, vector<16x16xf32>
    tpu.vector_store %arg22[%c8_27, %c0_28], %30 {strides = array<i32>} : memref<24x32xf32, #tpu.memory_space<vmem>>, vector<16x16xf32>,
    %cst_29 = arith.constant 0.000000e+00 : f32
    %32 = vector.broadcast %cst_29 : f32 to vector<16x16xf32>
    %c6_30 = arith.constant 6 : index
    %c0_31 = arith.constant 0 : index
    %33 = vector.load %arg22[%c6_30, %c0_31] : memref<24x32xf32, #tpu.memory_space<vmem>>, vector<16x16xf32>
    %34 = arith.truncf %33 : vector<16x16xf32> to vector<16x16xbf16>
    %c0_32 = arith.constant 0 : index
    %c0_33 = arith.constant 0 : index
    %c0_34 = arith.constant 0 : index
    %35 = vector.load %arg4[%c0_32, %c0_33, %c0_34] : memref<3x16x16xbf16, #tpu.memory_space<vmem>>, vector<1x16x16xbf16>
    %36 = vector.shape_cast %35 : vector<1x16x16xbf16> to vector<16x16xbf16>
    %cst_35 = arith.constant dense<0.000000e+00> : vector<16x16xf32>
    %37 = tpu.matmul %34, %36, %cst_35 {dimension_numbers = #tpu.dot_dimension_numbers<[1], [0], [0], [1], [0, 0, 1, 1], [], []>} : vector<16x16xbf16>, vector<16x16xbf16>, vector<16x16xf32> -> vector<16x16xf32>
    %38 = arith.addf %32, %37 : vector<16x16xf32>
    %c7_36 = arith.constant 7 : index
    %c0_37 = arith.constant 0 : index
    %39 = vector.load %arg22[%c7_36, %c0_37] : memref<24x32xf32, #tpu.memory_space<vmem>>, vector<16x16xf32>
    %40 = arith.truncf %39 : vector<16x16xf32> to vector<16x16xbf16>
    %c1_38 = arith.constant 1 : index
    %c0_39 = arith.constant 0 : index
    %c0_40 = arith.constant 0 : index
    %41 = vector.load %arg4[%c1_38, %c0_39, %c0_40] : memref<3x16x16xbf16, #tpu.memory_space<vmem>>, vector<1x16x16xbf16>
    %42 = vector.shape_cast %41 : vector<1x16x16xbf16> to vector<16x16xbf16>
    %cst_41 = arith.constant dense<0.000000e+00> : vector<16x16xf32>
    %43 = tpu.matmul %40, %42, %cst_41 {dimension_numbers = #tpu.dot_dimension_numbers<[1], [0], [0], [1], [0, 0, 1, 1], [], []>} : vector<16x16xbf16>, vector<16x16xbf16>, vector<16x16xf32> -> vector<16x16xf32>
    %44 = arith.addf %38, %43 : vector<16x16xf32>
    %c8_42 = arith.constant 8 : index
    %c0_43 = arith.constant 0 : index
    %45 = vector.load %arg22[%c8_42, %c0_43] : memref<24x32xf32, #tpu.memory_space<vmem>>, vector<16x16xf32>
    %46 = arith.truncf %45 : vector<16x16xf32> to vector<16x16xbf16>
    %c2_44 = arith.constant 2 : index
    %c0_45 = arith.constant 0 : index
    %c0_46 = arith.constant 0 : index
    %47 = vector.load %arg4[%c2_44, %c0_45, %c0_46] : memref<3x16x16xbf16, #tpu.memory_space<vmem>>, vector<1x16x16xbf16>
    %48 = vector.shape_cast %47 : vector<1x16x16xbf16> to vector<16x16xbf16>
    %cst_47 = arith.constant dense<0.000000e+00> : vector<16x16xf32>
    %49 = tpu.matmul %46, %48, %cst_47 {dimension_numbers = #tpu.dot_dimension_numbers<[1], [0], [0], [1], [0, 0, 1, 1], [], []>} : vector<16x16xbf16>, vector<16x16xbf16>, vector<16x16xf32> -> vector<16x16xf32>
    %50 = arith.addf %44, %49 : vector<16x16xf32>
    %c0_48 = arith.constant 0 : index
    %c0_49 = arith.constant 0 : index
    %51 = vector.load %arg5[%c0_48, %c0_49] : memref<1x16xf32, #tpu.memory_space<vmem>>, vector<1x16xf32>
    %52 = vector.broadcast %51 : vector<1x16xf32> to vector<16x16xf32>
    %53 = arith.addf %50, %52 : vector<16x16xf32>
    %cst_50 = arith.constant 0.000000e+00 : f32
    %54 = vector.broadcast %cst_50 : f32 to vector<16x16xf32>
    %55 = arith.maximumf %53, %54 : vector<16x16xf32>
    %56 = arith.truncf %6 : vector<16x4xf32> to vector<16x4xbf16>
    %c0_51 = arith.constant 0 : index
    %c0_52 = arith.constant 0 : index
    %57 = vector.load %arg6[%c0_51, %c0_52] : memref<4x16xbf16, #tpu.memory_space<vmem>>, vector<4x16xbf16>
    %cst_53 = arith.constant dense<0.000000e+00> : vector<16x16xf32>
    %58 = tpu.matmul %56, %57, %cst_53 {dimension_numbers = #tpu.dot_dimension_numbers<[1], [0], [0], [1], [0, 0, 1, 1], [], []>} : vector<16x4xbf16>, vector<4x16xbf16>, vector<16x16xf32> -> vector<16x16xf32>
    %c0_54 = arith.constant 0 : index
    %c0_55 = arith.constant 0 : index
    %59 = vector.load %arg7[%c0_54, %c0_55] : memref<1x16xf32, #tpu.memory_space<vmem>>, vector<1x16xf32>
    %60 = vector.broadcast %59 : vector<1x16xf32> to vector<16x16xf32>
    %61 = arith.addf %58, %60 : vector<16x16xf32>
    %62 = arith.addf %55, %61 : vector<16x16xf32>
    %cst_56 = arith.constant 0.000000e+00 : f32
    %63 = vector.broadcast %cst_56 : f32 to vector<16x16xf32>
    %64 = arith.maximumf %62, %63 : vector<16x16xf32>
    %c8_57 = arith.constant 8 : index
    %c0_58 = arith.constant 0 : index
    %65 = vector.load %arg21[%c8_57, %c0_58] : memref<24x32xf32, #tpu.memory_space<vmem>>, vector<16x16xf32>
    tpu.vector_store %arg21[%c8_57, %c0_58], %64 {strides = array<i32>} : memref<24x32xf32, #tpu.memory_space<vmem>>, vector<16x16xf32>,
    %c8_59 = arith.constant 8 : index
    %c0_60 = arith.constant 0 : index
    %66 = vector.load %arg21[%c8_59, %c0_60] : memref<24x32xf32, #tpu.memory_space<vmem>>, vector<16x16xf32>
    %cst_61 = arith.constant 0.000000e+00 : f32
    %67 = vector.broadcast %cst_61 : f32 to vector<16x32xf32>
    %c4 = arith.constant 4 : index
    %c0_62 = arith.constant 0 : index
    %68 = vector.load %arg21[%c4, %c0_62] : memref<24x32xf32, #tpu.memory_space<vmem>>, vector<16x16xf32>
    %69 = arith.truncf %68 : vector<16x16xf32> to vector<16x16xbf16>
    %c0_63 = arith.constant 0 : index
    %c0_64 = arith.constant 0 : index
    %c0_65 = arith.constant 0 : index
    %70 = vector.load %arg8[%c0_63, %c0_64, %c0_65] : memref<3x16x32xbf16, #tpu.memory_space<vmem>>, vector<1x16x32xbf16>
    %71 = vector.shape_cast %70 : vector<1x16x32xbf16> to vector<16x32xbf16>
    %cst_66 = arith.constant dense<0.000000e+00> : vector<16x32xf32>
    %72 = tpu.matmul %69, %71, %cst_66 {dimension_numbers = #tpu.dot_dimension_numbers<[1], [0], [0], [1], [0, 0, 1, 1], [], []>} : vector<16x16xbf16>, vector<16x32xbf16>, vector<16x32xf32> -> vector<16x32xf32>
    %73 = arith.addf %67, %72 : vector<16x32xf32>
    %c6_67 = arith.constant 6 : index
    %c0_68 = arith.constant 0 : index
    %74 = vector.load %arg21[%c6_67, %c0_68] : memref<24x32xf32, #tpu.memory_space<vmem>>, vector<16x16xf32>
    %75 = arith.truncf %74 : vector<16x16xf32> to vector<16x16xbf16>
    %c1_69 = arith.constant 1 : index
    %c0_70 = arith.constant 0 : index
    %c0_71 = arith.constant 0 : index
    %76 = vector.load %arg8[%c1_69, %c0_70, %c0_71] : memref<3x16x32xbf16, #tpu.memory_space<vmem>>, vector<1x16x32xbf16>
    %77 = vector.shape_cast %76 : vector<1x16x32xbf16> to vector<16x32xbf16>
    %cst_72 = arith.constant dense<0.000000e+00> : vector<16x32xf32>
    %78 = tpu.matmul %75, %77, %cst_72 {dimension_numbers = #tpu.dot_dimension_numbers<[1], [0], [0], [1], [0, 0, 1, 1], [], []>} : vector<16x16xbf16>, vector<16x32xbf16>, vector<16x32xf32> -> vector<16x32xf32>
    %79 = arith.addf %73, %78 : vector<16x32xf32>
    %c8_73 = arith.constant 8 : index
    %c0_74 = arith.constant 0 : index
    %80 = vector.load %arg21[%c8_73, %c0_74] : memref<24x32xf32, #tpu.memory_space<vmem>>, vector<16x16xf32>
    %81 = arith.truncf %80 : vector<16x16xf32> to vector<16x16xbf16>
    %c2_75 = arith.constant 2 : index
    %c0_76 = arith.constant 0 : index
    %c0_77 = arith.constant 0 : index
    %82 = vector.load %arg8[%c2_75, %c0_76, %c0_77] : memref<3x16x32xbf16, #tpu.memory_space<vmem>>, vector<1x16x32xbf16>
    %83 = vector.shape_cast %82 : vector<1x16x32xbf16> to vector<16x32xbf16>
    %cst_78 = arith.constant dense<0.000000e+00> : vector<16x32xf32>
    %84 = tpu.matmul %81, %83, %cst_78 {dimension_numbers = #tpu.dot_dimension_numbers<[1], [0], [0], [1], [0, 0, 1, 1], [], []>} : vector<16x16xbf16>, vector<16x32xbf16>, vector<16x32xf32> -> vector<16x32xf32>
    %85 = arith.addf %79, %84 : vector<16x32xf32>
    %c0_79 = arith.constant 0 : index
    %c0_80 = arith.constant 0 : index
    %86 = vector.load %arg9[%c0_79, %c0_80] : memref<1x32xf32, #tpu.memory_space<vmem>>, vector<1x32xf32>
    %87 = vector.broadcast %86 : vector<1x32xf32> to vector<16x32xf32>
    %88 = arith.addf %85, %87 : vector<16x32xf32>
    %cst_81 = arith.constant 0.000000e+00 : f32
    %89 = vector.broadcast %cst_81 : f32 to vector<16x32xf32>
    %90 = arith.maximumf %88, %89 : vector<16x32xf32>
    %c8_82 = arith.constant 8 : index
    %c0_83 = arith.constant 0 : index
    %91 = vector.load %arg22[%c8_82, %c0_83] : memref<24x32xf32, #tpu.memory_space<vmem>>, vector<16x32xf32>
    tpu.vector_store %arg22[%c8_82, %c0_83], %90 {strides = array<i32>} : memref<24x32xf32, #tpu.memory_space<vmem>>, vector<16x32xf32>,
    %cst_84 = arith.constant 0.000000e+00 : f32
    %92 = vector.broadcast %cst_84 : f32 to vector<16x32xf32>
    %c4_85 = arith.constant 4 : index
    %c0_86 = arith.constant 0 : index
    %93 = vector.load %arg22[%c4_85, %c0_86] : memref<24x32xf32, #tpu.memory_space<vmem>>, vector<16x32xf32>
    %94 = arith.truncf %93 : vector<16x32xf32> to vector<16x32xbf16>
    %c0_87 = arith.constant 0 : index
    %c0_88 = arith.constant 0 : index
    %c0_89 = arith.constant 0 : index
    %95 = vector.load %arg10[%c0_87, %c0_88, %c0_89] : memref<3x32x32xbf16, #tpu.memory_space<vmem>>, vector<1x32x32xbf16>
    %96 = vector.shape_cast %95 : vector<1x32x32xbf16> to vector<32x32xbf16>
    %cst_90 = arith.constant dense<0.000000e+00> : vector<16x32xf32>
    %97 = tpu.matmul %94, %96, %cst_90 {dimension_numbers = #tpu.dot_dimension_numbers<[1], [0], [0], [1], [0, 0, 1, 1], [], []>} : vector<16x32xbf16>, vector<32x32xbf16>, vector<16x32xf32> -> vector<16x32xf32>
    %98 = arith.addf %92, %97 : vector<16x32xf32>
    %c6_91 = arith.constant 6 : index
    %c0_92 = arith.constant 0 : index
    %99 = vector.load %arg22[%c6_91, %c0_92] : memref<24x32xf32, #tpu.memory_space<vmem>>, vector<16x32xf32>
    %100 = arith.truncf %99 : vector<16x32xf32> to vector<16x32xbf16>
    %c1_93 = arith.constant 1 : index
    %c0_94 = arith.constant 0 : index
    %c0_95 = arith.constant 0 : index
    %101 = vector.load %arg10[%c1_93, %c0_94, %c0_95] : memref<3x32x32xbf16, #tpu.memory_space<vmem>>, vector<1x32x32xbf16>
    %102 = vector.shape_cast %101 : vector<1x32x32xbf16> to vector<32x32xbf16>
    %cst_96 = arith.constant dense<0.000000e+00> : vector<16x32xf32>
    %103 = tpu.matmul %100, %102, %cst_96 {dimension_numbers = #tpu.dot_dimension_numbers<[1], [0], [0], [1], [0, 0, 1, 1], [], []>} : vector<16x32xbf16>, vector<32x32xbf16>, vector<16x32xf32> -> vector<16x32xf32>
    %104 = arith.addf %98, %103 : vector<16x32xf32>
    %c8_97 = arith.constant 8 : index
    %c0_98 = arith.constant 0 : index
    %105 = vector.load %arg22[%c8_97, %c0_98] : memref<24x32xf32, #tpu.memory_space<vmem>>, vector<16x32xf32>
    %106 = arith.truncf %105 : vector<16x32xf32> to vector<16x32xbf16>
    %c2_99 = arith.constant 2 : index
    %c0_100 = arith.constant 0 : index
    %c0_101 = arith.constant 0 : index
    %107 = vector.load %arg10[%c2_99, %c0_100, %c0_101] : memref<3x32x32xbf16, #tpu.memory_space<vmem>>, vector<1x32x32xbf16>
    %108 = vector.shape_cast %107 : vector<1x32x32xbf16> to vector<32x32xbf16>
    %cst_102 = arith.constant dense<0.000000e+00> : vector<16x32xf32>
    %109 = tpu.matmul %106, %108, %cst_102 {dimension_numbers = #tpu.dot_dimension_numbers<[1], [0], [0], [1], [0, 0, 1, 1], [], []>} : vector<16x32xbf16>, vector<32x32xbf16>, vector<16x32xf32> -> vector<16x32xf32>
    %110 = arith.addf %104, %109 : vector<16x32xf32>
    %c0_103 = arith.constant 0 : index
    %c0_104 = arith.constant 0 : index
    %111 = vector.load %arg11[%c0_103, %c0_104] : memref<1x32xf32, #tpu.memory_space<vmem>>, vector<1x32xf32>
    %112 = vector.broadcast %111 : vector<1x32xf32> to vector<16x32xf32>
    %113 = arith.addf %110, %112 : vector<16x32xf32>
    %cst_105 = arith.constant 0.000000e+00 : f32
    %114 = vector.broadcast %cst_105 : f32 to vector<16x32xf32>
    %115 = arith.maximumf %113, %114 : vector<16x32xf32>
    %116 = arith.truncf %66 : vector<16x16xf32> to vector<16x16xbf16>
    %c0_106 = arith.constant 0 : index
    %c0_107 = arith.constant 0 : index
    %117 = vector.load %arg12[%c0_106, %c0_107] : memref<16x32xbf16, #tpu.memory_space<vmem>>, vector<16x32xbf16>
    %cst_108 = arith.constant dense<0.000000e+00> : vector<16x32xf32>
    %118 = tpu.matmul %116, %117, %cst_108 {dimension_numbers = #tpu.dot_dimension_numbers<[1], [0], [0], [1], [0, 0, 1, 1], [], []>} : vector<16x16xbf16>, vector<16x32xbf16>, vector<16x32xf32> -> vector<16x32xf32>
    %c0_109 = arith.constant 0 : index
    %c0_110 = arith.constant 0 : index
    %119 = vector.load %arg13[%c0_109, %c0_110] : memref<1x32xf32, #tpu.memory_space<vmem>>, vector<1x32xf32>
    %120 = vector.broadcast %119 : vector<1x32xf32> to vector<16x32xf32>
    %121 = arith.addf %118, %120 : vector<16x32xf32>
    %122 = arith.addf %115, %121 : vector<16x32xf32>
    %cst_111 = arith.constant 0.000000e+00 : f32
    %123 = vector.broadcast %cst_111 : f32 to vector<16x32xf32>
    %124 = arith.maximumf %122, %123 : vector<16x32xf32>
    %c8_112 = arith.constant 8 : index
    %c0_113 = arith.constant 0 : index
    %125 = vector.load %arg21[%c8_112, %c0_113] : memref<24x32xf32, #tpu.memory_space<vmem>>, vector<16x32xf32>
    tpu.vector_store %arg21[%c8_112, %c0_113], %124 {strides = array<i32>} : memref<24x32xf32, #tpu.memory_space<vmem>>, vector<16x32xf32>,
    %c8_114 = arith.constant 8 : index
    %c0_115 = arith.constant 0 : index
    %126 = vector.load %arg21[%c8_114, %c0_115] : memref<24x32xf32, #tpu.memory_space<vmem>>, vector<16x32xf32>
    %cst_116 = arith.constant 0.000000e+00 : f32
    %127 = vector.broadcast %cst_116 : f32 to vector<16x32xf32>
    %c0_117 = arith.constant 0 : index
    %c0_118 = arith.constant 0 : index
    %128 = vector.load %arg21[%c0_117, %c0_118] : memref<24x32xf32, #tpu.memory_space<vmem>>, vector<16x32xf32>
    %129 = arith.truncf %128 : vector<16x32xf32> to vector<16x32xbf16>
    %c0_119 = arith.constant 0 : index
    %c0_120 = arith.constant 0 : index
    %c0_121 = arith.constant 0 : index
    %130 = vector.load %arg14[%c0_119, %c0_120, %c0_121] : memref<3x32x32xbf16, #tpu.memory_space<vmem>>, vector<1x32x32xbf16>
    %131 = vector.shape_cast %130 : vector<1x32x32xbf16> to vector<32x32xbf16>
    %cst_122 = arith.constant dense<0.000000e+00> : vector<16x32xf32>
    %132 = tpu.matmul %129, %131, %cst_122 {dimension_numbers = #tpu.dot_dimension_numbers<[1], [0], [0], [1], [0, 0, 1, 1], [], []>} : vector<16x32xbf16>, vector<32x32xbf16>, vector<16x32xf32> -> vector<16x32xf32>
    %133 = arith.addf %127, %132 : vector<16x32xf32>
    %c4_123 = arith.constant 4 : index
    %c0_124 = arith.constant 0 : index
    %134 = vector.load %arg21[%c4_123, %c0_124] : memref<24x32xf32, #tpu.memory_space<vmem>>, vector<16x32xf32>
    %135 = arith.truncf %134 : vector<16x32xf32> to vector<16x32xbf16>
    %c1_125 = arith.constant 1 : index
    %c0_126 = arith.constant 0 : index
    %c0_127 = arith.constant 0 : index
    %136 = vector.load %arg14[%c1_125, %c0_126, %c0_127] : memref<3x32x32xbf16, #tpu.memory_space<vmem>>, vector<1x32x32xbf16>
    %137 = vector.shape_cast %136 : vector<1x32x32xbf16> to vector<32x32xbf16>
    %cst_128 = arith.constant dense<0.000000e+00> : vector<16x32xf32>
    %138 = tpu.matmul %135, %137, %cst_128 {dimension_numbers = #tpu.dot_dimension_numbers<[1], [0], [0], [1], [0, 0, 1, 1], [], []>} : vector<16x32xbf16>, vector<32x32xbf16>, vector<16x32xf32> -> vector<16x32xf32>
    %139 = arith.addf %133, %138 : vector<16x32xf32>
    %c8_129 = arith.constant 8 : index
    %c0_130 = arith.constant 0 : index
    %140 = vector.load %arg21[%c8_129, %c0_130] : memref<24x32xf32, #tpu.memory_space<vmem>>, vector<16x32xf32>
    %141 = arith.truncf %140 : vector<16x32xf32> to vector<16x32xbf16>
    %c2_131 = arith.constant 2 : index
    %c0_132 = arith.constant 0 : index
    %c0_133 = arith.constant 0 : index
    %142 = vector.load %arg14[%c2_131, %c0_132, %c0_133] : memref<3x32x32xbf16, #tpu.memory_space<vmem>>, vector<1x32x32xbf16>
    %143 = vector.shape_cast %142 : vector<1x32x32xbf16> to vector<32x32xbf16>
    %cst_134 = arith.constant dense<0.000000e+00> : vector<16x32xf32>
    %144 = tpu.matmul %141, %143, %cst_134 {dimension_numbers = #tpu.dot_dimension_numbers<[1], [0], [0], [1], [0, 0, 1, 1], [], []>} : vector<16x32xbf16>, vector<32x32xbf16>, vector<16x32xf32> -> vector<16x32xf32>
    %145 = arith.addf %139, %144 : vector<16x32xf32>
    %c0_135 = arith.constant 0 : index
    %c0_136 = arith.constant 0 : index
    %146 = vector.load %arg15[%c0_135, %c0_136] : memref<1x32xf32, #tpu.memory_space<vmem>>, vector<1x32xf32>
    %147 = vector.broadcast %146 : vector<1x32xf32> to vector<16x32xf32>
    %148 = arith.addf %145, %147 : vector<16x32xf32>
    %cst_137 = arith.constant 0.000000e+00 : f32
    %149 = vector.broadcast %cst_137 : f32 to vector<16x32xf32>
    %150 = arith.maximumf %148, %149 : vector<16x32xf32>
    %c8_138 = arith.constant 8 : index
    %c0_139 = arith.constant 0 : index
    %151 = vector.load %arg22[%c8_138, %c0_139] : memref<24x32xf32, #tpu.memory_space<vmem>>, vector<16x32xf32>
    tpu.vector_store %arg22[%c8_138, %c0_139], %150 {strides = array<i32>} : memref<24x32xf32, #tpu.memory_space<vmem>>, vector<16x32xf32>,
    %cst_140 = arith.constant 0.000000e+00 : f32
    %152 = vector.broadcast %cst_140 : f32 to vector<16x32xf32>
    %c0_141 = arith.constant 0 : index
    %c0_142 = arith.constant 0 : index
    %153 = vector.load %arg22[%c0_141, %c0_142] : memref<24x32xf32, #tpu.memory_space<vmem>>, vector<16x32xf32>
    %154 = arith.truncf %153 : vector<16x32xf32> to vector<16x32xbf16>
    %c0_143 = arith.constant 0 : index
    %c0_144 = arith.constant 0 : index
    %c0_145 = arith.constant 0 : index
    %155 = vector.load %arg16[%c0_143, %c0_144, %c0_145] : memref<3x32x32xbf16, #tpu.memory_space<vmem>>, vector<1x32x32xbf16>
    %156 = vector.shape_cast %155 : vector<1x32x32xbf16> to vector<32x32xbf16>
    %cst_146 = arith.constant dense<0.000000e+00> : vector<16x32xf32>
    %157 = tpu.matmul %154, %156, %cst_146 {dimension_numbers = #tpu.dot_dimension_numbers<[1], [0], [0], [1], [0, 0, 1, 1], [], []>} : vector<16x32xbf16>, vector<32x32xbf16>, vector<16x32xf32> -> vector<16x32xf32>
    %158 = arith.addf %152, %157 : vector<16x32xf32>
    %c4_147 = arith.constant 4 : index
    %c0_148 = arith.constant 0 : index
    %159 = vector.load %arg22[%c4_147, %c0_148] : memref<24x32xf32, #tpu.memory_space<vmem>>, vector<16x32xf32>
    %160 = arith.truncf %159 : vector<16x32xf32> to vector<16x32xbf16>
    %c1_149 = arith.constant 1 : index
    %c0_150 = arith.constant 0 : index
    %c0_151 = arith.constant 0 : index
    %161 = vector.load %arg16[%c1_149, %c0_150, %c0_151] : memref<3x32x32xbf16, #tpu.memory_space<vmem>>, vector<1x32x32xbf16>
    %162 = vector.shape_cast %161 : vector<1x32x32xbf16> to vector<32x32xbf16>
    %cst_152 = arith.constant dense<0.000000e+00> : vector<16x32xf32>
    %163 = tpu.matmul %160, %162, %cst_152 {dimension_numbers = #tpu.dot_dimension_numbers<[1], [0], [0], [1], [0, 0, 1, 1], [], []>} : vector<16x32xbf16>, vector<32x32xbf16>, vector<16x32xf32> -> vector<16x32xf32>
    %164 = arith.addf %158, %163 : vector<16x32xf32>
    %c8_153 = arith.constant 8 : index
    %c0_154 = arith.constant 0 : index
    %165 = vector.load %arg22[%c8_153, %c0_154] : memref<24x32xf32, #tpu.memory_space<vmem>>, vector<16x32xf32>
    %166 = arith.truncf %165 : vector<16x32xf32> to vector<16x32xbf16>
    %c2_155 = arith.constant 2 : index
    %c0_156 = arith.constant 0 : index
    %c0_157 = arith.constant 0 : index
    %167 = vector.load %arg16[%c2_155, %c0_156, %c0_157] : memref<3x32x32xbf16, #tpu.memory_space<vmem>>, vector<1x32x32xbf16>
    %168 = vector.shape_cast %167 : vector<1x32x32xbf16> to vector<32x32xbf16>
    %cst_158 = arith.constant dense<0.000000e+00> : vector<16x32xf32>
    %169 = tpu.matmul %166, %168, %cst_158 {dimension_numbers = #tpu.dot_dimension_numbers<[1], [0], [0], [1], [0, 0, 1, 1], [], []>} : vector<16x32xbf16>, vector<32x32xbf16>, vector<16x32xf32> -> vector<16x32xf32>
    %170 = arith.addf %164, %169 : vector<16x32xf32>
    %c0_159 = arith.constant 0 : index
    %c0_160 = arith.constant 0 : index
    %171 = vector.load %arg17[%c0_159, %c0_160] : memref<1x32xf32, #tpu.memory_space<vmem>>, vector<1x32xf32>
    %172 = vector.broadcast %171 : vector<1x32xf32> to vector<16x32xf32>
    %173 = arith.addf %170, %172 : vector<16x32xf32>
    %cst_161 = arith.constant 0.000000e+00 : f32
    %174 = vector.broadcast %cst_161 : f32 to vector<16x32xf32>
    %175 = arith.maximumf %173, %174 : vector<16x32xf32>
    %176 = arith.addf %175, %126 : vector<16x32xf32>
    %cst_162 = arith.constant 0.000000e+00 : f32
    %177 = vector.broadcast %cst_162 : f32 to vector<16x32xf32>
    %178 = arith.maximumf %176, %177 : vector<16x32xf32>
    %179 = vector.extract_strided_slice %178 {offsets = [15, 0], sizes = [1, 32], strides = [1, 1]} : vector<16x32xf32> to vector<1x32xf32>
    %180 = arith.truncf %179 : vector<1x32xf32> to vector<1x32xbf16>
    %c0_163 = arith.constant 0 : index
    %c0_164 = arith.constant 0 : index
    %181 = vector.load %arg18[%c0_163, %c0_164] : memref<32x3xbf16, #tpu.memory_space<vmem>>, vector<32x3xbf16>
    %cst_165 = arith.constant dense<0.000000e+00> : vector<1x3xf32>
    %182 = tpu.matmul %180, %181, %cst_165 {dimension_numbers = #tpu.dot_dimension_numbers<[1], [0], [0], [1], [0, 0, 1, 1], [], []>} : vector<1x32xbf16>, vector<32x3xbf16>, vector<1x3xf32> -> vector<1x3xf32>
    %c0_166 = arith.constant 0 : index
    %c0_167 = arith.constant 0 : index
    %183 = vector.load %arg19[%c0_166, %c0_167] : memref<1x3xf32, #tpu.memory_space<vmem>>, vector<1x3xf32>
    %184 = arith.addf %182, %183 : vector<1x3xf32>
    %c0_168 = arith.constant 0 : index
    %c0_169 = arith.constant 0 : index
    %c0_170 = arith.constant 0 : index
    %185 = vector.load %arg20[%c0_168, %c0_169, %c0_170] : memref<1x1x3xf32, #tpu.memory_space<vmem>>, vector<1x1x3xf32>
    %186 = vector.shape_cast %185 : vector<1x1x3xf32> to vector<1x3xf32>
    %187 = vector.shape_cast %184 : vector<1x3xf32> to vector<1x1x3xf32>
    tpu.vector_store %arg20[%c0_168, %c0_169, %c0_170], %187 {strides = array<i32>} : memref<1x1x3xf32, #tpu.memory_space<vmem>>, vector<1x1x3xf32>,
    return
  }
  func.func @transform_0(%arg0: i32) -> (i32, i32, i32) {
    %c0_i32 = arith.constant 0 : i32
    %c0_i32_0 = arith.constant 0 : i32
    %c0_i32_1 = arith.constant 0 : i32
    return %arg0, %c0_i32, %c0_i32_0 : i32, i32, i32
  }
  func.func @transform_1(%arg0: i32) -> (i32, i32, i32) {
    %c0_i32 = arith.constant 0 : i32
    %c0_i32_0 = arith.constant 0 : i32
    %c0_i32_1 = arith.constant 0 : i32
    %c0_i32_2 = arith.constant 0 : i32
    return %c0_i32, %c0_i32_0, %c0_i32_1 : i32, i32, i32
  }
  func.func @transform_2(%arg0: i32) -> (i32, i32) {
    %c0_i32 = arith.constant 0 : i32
    %c0_i32_0 = arith.constant 0 : i32
    %c0_i32_1 = arith.constant 0 : i32
    return %c0_i32, %c0_i32_0 : i32, i32
  }
  func.func @transform_3(%arg0: i32) -> (i32, i32, i32) {
    %c0_i32 = arith.constant 0 : i32
    %c0_i32_0 = arith.constant 0 : i32
    %c0_i32_1 = arith.constant 0 : i32
    %c0_i32_2 = arith.constant 0 : i32
    return %c0_i32, %c0_i32_0, %c0_i32_1 : i32, i32, i32
  }
  func.func @transform_4(%arg0: i32) -> (i32, i32) {
    %c0_i32 = arith.constant 0 : i32
    %c0_i32_0 = arith.constant 0 : i32
    %c0_i32_1 = arith.constant 0 : i32
    return %c0_i32, %c0_i32_0 : i32, i32
  }
  func.func @transform_5(%arg0: i32) -> (i32, i32) {
    %c0_i32 = arith.constant 0 : i32
    %c0_i32_0 = arith.constant 0 : i32
    %c0_i32_1 = arith.constant 0 : i32
    return %c0_i32, %c0_i32_0 : i32, i32
  }
  func.func @transform_6(%arg0: i32) -> (i32, i32) {
    %c0_i32 = arith.constant 0 : i32
    %c0_i32_0 = arith.constant 0 : i32
    %c0_i32_1 = arith.constant 0 : i32
    return %c0_i32, %c0_i32_0 : i32, i32
  }
  func.func @transform_7(%arg0: i32) -> (i32, i32, i32) {
    %c0_i32 = arith.constant 0 : i32
    %c0_i32_0 = arith.constant 0 : i32
    %c0_i32_1 = arith.constant 0 : i32
    %c0_i32_2 = arith.constant 0 : i32
    return %c0_i32, %c0_i32_0, %c0_i32_1 : i32, i32, i32
  }
  func.func @transform_8(%arg0: i32) -> (i32, i32) {
    %c0_i32 = arith.constant 0 : i32
    %c0_i32_0 = arith.constant 0 : i32
    %c0_i32_1 = arith.constant 0 : i32
    return %c0_i32, %c0_i32_0 : i32, i32
  }
  func.func @transform_9(%arg0: i32) -> (i32, i32, i32) {
    %c0_i32 = arith.constant 0 : i32
    %c0_i32_0 = arith.constant 0 : i32
    %c0_i32_1 = arith.constant 0 : i32
    %c0_i32_2 = arith.constant 0 : i32
    return %c0_i32, %c0_i32_0, %c0_i32_1 : i32, i32, i32
  }
  func.func @transform_10(%arg0: i32) -> (i32, i32) {
    %c0_i32 = arith.constant 0 : i32
    %c0_i32_0 = arith.constant 0 : i32
    %c0_i32_1 = arith.constant 0 : i32
    return %c0_i32, %c0_i32_0 : i32, i32
  }
  func.func @transform_11(%arg0: i32) -> (i32, i32) {
    %c0_i32 = arith.constant 0 : i32
    %c0_i32_0 = arith.constant 0 : i32
    %c0_i32_1 = arith.constant 0 : i32
    return %c0_i32, %c0_i32_0 : i32, i32
  }
  func.func @transform_12(%arg0: i32) -> (i32, i32) {
    %c0_i32 = arith.constant 0 : i32
    %c0_i32_0 = arith.constant 0 : i32
    %c0_i32_1 = arith.constant 0 : i32
    return %c0_i32, %c0_i32_0 : i32, i32
  }
  func.func @transform_13(%arg0: i32) -> (i32, i32, i32) {
    %c0_i32 = arith.constant 0 : i32
    %c0_i32_0 = arith.constant 0 : i32
    %c0_i32_1 = arith.constant 0 : i32
    %c0_i32_2 = arith.constant 0 : i32
    return %c0_i32, %c0_i32_0, %c0_i32_1 : i32, i32, i32
  }
  func.func @transform_14(%arg0: i32) -> (i32, i32) {
    %c0_i32 = arith.constant 0 : i32
    %c0_i32_0 = arith.constant 0 : i32
    %c0_i32_1 = arith.constant 0 : i32
    return %c0_i32, %c0_i32_0 : i32, i32
  }
  func.func @transform_15(%arg0: i32) -> (i32, i32, i32) {
    %c0_i32 = arith.constant 0 : i32
    %c0_i32_0 = arith.constant 0 : i32
    %c0_i32_1 = arith.constant 0 : i32
    %c0_i32_2 = arith.constant 0 : i32
    return %c0_i32, %c0_i32_0, %c0_i32_1 : i32, i32, i32
  }
  func.func @transform_16(%arg0: i32) -> (i32, i32) {
    %c0_i32 = arith.constant 0 : i32
    %c0_i32_0 = arith.constant 0 : i32
    %c0_i32_1 = arith.constant 0 : i32
    return %c0_i32, %c0_i32_0 : i32, i32
  }
  func.func @transform_17(%arg0: i32) -> (i32, i32) {
    %c0_i32 = arith.constant 0 : i32
    %c0_i32_0 = arith.constant 0 : i32
    %c0_i32_1 = arith.constant 0 : i32
    return %c0_i32, %c0_i32_0 : i32, i32
  }
  func.func @transform_18(%arg0: i32) -> (i32, i32) {
    %c0_i32 = arith.constant 0 : i32
    %c0_i32_0 = arith.constant 0 : i32
    %c0_i32_1 = arith.constant 0 : i32
    return %c0_i32, %c0_i32_0 : i32, i32
  }
  func.func @transform_19(%arg0: i32) -> (i32, i32, i32) {
    %c0_i32 = arith.constant 0 : i32
    %c0_i32_0 = arith.constant 0 : i32
    %c0_i32_1 = arith.constant 0 : i32
    return %arg0, %c0_i32, %c0_i32_0 : i32, i32, i32
  }
}

</mosaic_0001>

<bundles_post_ra>
// kernel: tpu_custom_call.1
= control target key start
LH: loop header
LB: loop body
LE: loop exit
PB: predicated region body
PF: predicated region fallthrough
CT: control target
= control target key end

     0   :  { %s3642_s0 = inlined_call_operand.vmem [shape: f32[2,16,4], index: 0, kind: input, shape index: {}]   ;;  %s3643_s1 = inlined_call_operand.hbm [shape: bf16[3,4,16], index: 1, kind: input, shape index: {}]   ;;  %s3644_s2 = inlined_call_operand.vmem [shape: f32[1,16], index: 2, kind: input, shape index: {}]   ;;  %s3645_s3 = inlined_call_operand.hbm [shape: bf16[3,16,16], index: 3, kind: input, shape index: {}]   ;;  %s3646_s4 = inlined_call_operand.hbm [shape: f32[1,16], index: 4, kind: input, shape index: {}]   ;;  %s3647_s5 = inlined_call_operand.vmem [shape: bf16[4,16], index: 5, kind: input, shape index: {}]   ;;  %s3648_s6 = inlined_call_operand.hbm [shape: f32[1,16], index: 6, kind: input, shape index: {}]   ;;  %s3649_s7 = inlined_call_operand.hbm [shape: bf16[3,16,32], index: 7, kind: input, shape index: {}]   ;;  %s3650_s8 = inlined_call_operand.hbm [shape: f32[1,32], index: 8, kind: input, shape index: {}]   ;;  %s3651_s9 = inlined_call_operand.vmem [shape: bf16[3,32,32], index: 9, kind: input, shape index: {}]   ;;  %s3652_s10 = inlined_call_operand.hbm [shape: f32[1,32], index: 10, kind: input, shape index: {}]   ;;  %s3653_s11 = inlined_call_operand.hbm [shape: bf16[16,32], index: 11, kind: input, shape index: {}]   ;;  %s3654_s12 = inlined_call_operand.vmem [shape: f32[1,32], index: 12, kind: input, shape index: {}]   ;;  %s3655_s13 = inlined_call_operand.vmem [shape: bf16[3,32,32], index: 13, kind: input, shape index: {}]   ;;  %s3656_s14 = inlined_call_operand.vmem [shape: f32[1,32], index: 14, kind: input, shape index: {}]   ;;  %s3657_s15 = inlined_call_operand.hbm [shape: bf16[3,32,32], index: 15, kind: input, shape index: {}]   ;;  %s3658_s16 = inlined_call_operand.vmem [shape: f32[1,32], index: 16, kind: input, shape index: {}]   ;;  %s3659_s17 = inlined_call_operand.vmem [shape: bf16[32,3], index: 17, kind: input, shape index: {}]   ;;  %s3660_s18 = inlined_call_operand.vmem [shape: f32[1,3], index: 18, kind: input, shape index: {}]   ;;  %s3661_s19 = inlined_call_operand.hbm [shape: f32[2,1,3], index: 19, kind: output, shape index: {}]  }
   0x1   :  { %3683 = sst [smem:[#allocation34_spill]] %s3642_s0 }
   0x2   :  { %3684 = sst [smem:[#allocation35_spill]] %s3643_s1 }
   0x3   :  { %3685 = sst [smem:[#allocation36_spill]] %s3644_s2 }
   0x4   :  { %3686 = sst [smem:[#allocation37_spill]] %s3645_s3 }
   0x5   :  { %3687 = sst [smem:[#allocation38_spill]] %s3648_s6 }
   0x6   :  { %3688 = sst [smem:[#allocation39_spill]] %s3650_s8 }
   0x7   :  { %3689 = sst [smem:[#allocation40_spill]] %s3653_s11 }
   0x8   :  { %3690 = sst [smem:[#allocation41_spill]] %s3658_s16 }
   0x9   :  { %3691 = sst [smem:[#allocation42_spill]] %s3659_s17 }
   0xa   :  { %3692 = sst [smem:[#allocation43_spill]] %s3660_s18 }
   0xb   :  { %3693 = sst [smem:[#allocation44_spill]] %s3661_s19 }
   0xc   :  { %24 = vsyncpa [#allocation5], 0 }
   0xd   :  { %25 = vsyncpa [#allocation8], 0 }
   0xe   :  { %26 = vsyncpa [#allocation11], 0 }
   0xf   :  { %27 = vsyncpa [#allocation14], 0 }
  0x10   :  { %28 = vsyncpa [#allocation17], 0 }
  0x11   :  { %29 = vsyncpa [#allocation6], 0 }
  0x12   :  { %31 = vsyncpa [#allocation6 + $0x1], 0  ;;  %s3131_s0 = smov 0   ;;  %s3133_s30 = smov 0  }
  0x13   :  { %s3135_s20 = smov 0   ;;  %s3137_s21 = smov 0  }
  0x14 LB: > { %3694 = sst [smem:[#allocation26_spill]] %s3001_s0  ;;  %s3152_s1 = sadd.s32 4294967295, %s3013_s21   ;;  %s3013_s21 = sphi %s3137_s21, %s3739_s21   ;;  %s3009_s20 = sphi %s3135_s20, %s3742_s20   ;;  %s3005_s30 = sphi %s3133_s30, %s3741_s30   ;;  %s3001_s0 = sphi %s3131_s0, %s3740_s0  }
  0x15   : > { %3695 = sst [smem:[#allocation27_spill]] %s3005_s30  ;;  %s2218_s22 = sadd.s32 4294967294, %s3013_s21  }
  0x16   : > { %3696 = sst [smem:[#allocation28_spill]] %s3009_s20  ;;  %s3156_s2 = sadd.s32 1, %s3013_s21  }
  0x17   : > { %3697 = sst [smem:[#allocation29_spill]] %s3013_s21  ;;  %s448_s23 = sadd.s32 1, %s3009_s20 }
  0x18   : > { %3698 = sst [smem:[#allocation30_spill]] %s3156_s2  ;;  %s445_s24 = ssub.s32 %s3013_s21, %s3156_s2 }
  0x19   : > { %p458_p0 = scmp.ne.s32.totalorder %s3009_s20, %s3005_s30  ;;  %p446_p1 = scmp.eq.s32.totalorder %s445_s24, 0 }
  0x1a   : > { %p459_p2 = scmp.eq.s32.totalorder %s3152_s1, 1  ;;  %p464_p3 = scmp.ne.s32.totalorder %s3005_s30, %s3001_s0 }
  0x1b   : > { %p465_p4 = scmp.eq.s32.totalorder %s2218_s22, 1  ;;  %p2219_p7 = scmp.ge.s32.totalorder %s3013_s21, 1 }
  0x1c   : > { %s3167_s25 = scalar_select %p446_p1, %s3009_s20, %s448_s23  }
  0x1d   : > { %p3169_p5 = por %p459_p2, %p458_p0  ;;  %p3173_p6 = por %p465_p4, %p464_p3 }
  0x1e   : > { %3699 = sst [smem:[#allocation31_spill]] %s3167_s25  ;;  %p472_p8 = scmp.lt.s32.totalorder %s3013_s21, 3 }
  0x1f   : > { %s3700_s3 = scalar_select %p3169_p5, 1, 0 }
  0x20   : > { %s3702_s26 = scalar_select %p3173_p6, 1, 0 }
  0x21   : > { %3701 = sst [smem:[#allocation32_spill]] %s3700_s3  ;;  %p3673_p9 = scmp.eq.s32.totalorder %s3152_s1, 0 }
  0x22   : > { %3703 = sst [smem:[#allocation33_spill]] %s3702_s26  ;;  %p3180_p10 = pnand %p2219_p7, %p472_p8 }
  0x23   : > { %s3015_s28 = smov [#allocation7]   ;;  %s3016_s23 = smov [#allocation10]  }
  0x24   : > { %s3704_s27 = scalar_select %p3180_p10, 1, 0 }
  0x25   : > { %s500_s29 = sshll.u32 %s3015_s28, 4  ;;  %p2554_p11 = pneg %p3180_p10  ;;  %s3186_s29 = int_to_ptr.vmem [resolvable:$true] %s500_s29 }
  0x26   : > { %s528_s24 = sshll.u32 %s3016_s23, 4  ;;  %s3017_s25 = smov [#allocation13]   ;;  %s3194_s24 = int_to_ptr.vmem [resolvable:$true] %s528_s24 }
  0x27   : > { %p3190_p12 = pnand %p3673_p9, %p2554_p11  ;;  %s3196_s20 = sshll.u32 %s3017_s25, 4  ;;  %s553_s20 = int_to_ptr.vmem [resolvable:$true] %s3196_s20 }
  0x28   : > { %s3706_s28 = sld [smem:[#allocation37_spill]] }
  0x29   : > { %p3206_p0 = pneg %p3190_p12 }
  0x2e   : > { %s2679_s0 = scalar_lea.hbm %s3706_s28, 384 }
  0x2f   : > { %p2680_p13 = scmp.ne.s32.totalorder %s3706_s28, %s2679_s0  ;;  %p2686_p3 = scmp.lt.u32.totalorder %s2679_s0, %s3706_s28 }
  0x31   : > { %p2682_p1 = pnand %p3206_p0, %p2680_p13 }
  0x33   : > { %p2683_p2 = pneg %p2682_p1 }
  0x35   : > { %p2688_p4 = pnand %p2686_p3, %p2683_p2 }
  0x37   : > { %2691 = shalt.err (!%p2688_p4)
}
  0x38   : > { %s2692_s19 = scalar_lea.vmem %s3186_s29, 384  ;;  %p2700_p9 = scmp.lt.s32.totalorder %s3186_s29, %s3186_s29 }
  0x39   : > { %p2693_p7 = scmp.ne.s32.totalorder %s3186_s29, %s2692_s19  ;;  %p2701_p6 = scmp.lt.s32.totalorder %s2692_s19, %s2692_s19 }
  0x3b   : > { %p2695_p8 = pnand %p2693_p7, %p3206_p0  ;;  %p2702_p13 = por %p2701_p6, %p2700_p9 }
  0x3d   : > { %p2696_p11 = pneg %p2695_p8 }
  0x3f   : > { %p2703_p1 = pnand %p2702_p13, %p2696_p11 }
  0x41   : > { %2706 = shalt.err (!%p2703_p1)
}
  0x42   : > { %s3678_s21 = smov 64   ;;  %s3680_s0 = smov 4  }
  0x43   : > { %2560 = dma.hbm_to_vmem [thread:$0]  (!%p3190_p12), %s3706_s28, 384, %s3186_s29, [#allocation8], %s3678_s21, %s3678_s21, %s3680_s0  }
  0x44   : > { %s3708_s6 = sld [smem:[#allocation38_spill]] }
  0x4a   : > { %s2707_s19 = scalar_lea.hbm %s3708_s6, 16 }
  0x4b   : > { %p2708_p6 = scmp.ne.s32.totalorder %s3708_s6, %s2707_s19  ;;  %p2714_p3 = scmp.lt.u32.totalorder %s2707_s19, %s3708_s6 }
  0x4d   : > { %p2710_p9 = pnand %p2708_p6, %p3206_p0 }
  0x4f   : > { %p2711_p2 = pneg %p2710_p9 }
  0x51   : > { %p2716_p4 = pnand %p2714_p3, %p2711_p2 }
  0x53   : > { %2719 = shalt.err (!%p2716_p4)
}
  0x54   : > { %s2720_s29 = scalar_lea.vmem %s3194_s24, 16  ;;  %s2727_s16 = scalar_lea.vmem %s3194_s24, 32 }
  0x55   : > { %p2721_p7 = scmp.ne.s32.totalorder %s3194_s24, %s2720_s29  ;;  %p2728_p13 = scmp.lt.s32.totalorder %s3194_s24, %s3194_s24 }
  0x56   : > { %p2729_p1 = scmp.lt.s32.totalorder %s2727_s16, %s2720_s29 }
  0x57   : > { %p2723_p8 = pnand %p2721_p7, %p3206_p0 }
  0x58   : > { %p2730_p6 = por %p2729_p1, %p2728_p13 }
  0x59   : > { %p2724_p11 = pneg %p2723_p8 }
  0x5b   : > { %p2731_p9 = pnand %p2730_p6, %p2724_p11 }
  0x5d   : > { %2734 = shalt.err (!%p2731_p9)
}
  0x5e   : > { %2566 = dma.hbm_to_vmem [thread:$0]  (!%p3190_p12), %s3708_s6, 16, %s3194_s24, [#allocation11]  }
  0x5f   : > { %s3709_s8 = sld [smem:[#allocation39_spill]] }
  0x65   : > { %s2735_s26 = scalar_lea.hbm %s3709_s8, 16 }
  0x66   : > { %p2736_p2 = scmp.ne.s32.totalorder %s3709_s8, %s2735_s26  ;;  %p2742_p7 = scmp.lt.u32.totalorder %s2735_s26, %s3709_s8 }
  0x68   : > { %p2738_p3 = pnand %p2736_p2, %p3206_p0 }
  0x6a   : > { %p2739_p4 = pneg %p2738_p3 }
  0x6c   : > { %p2744_p8 = pnand %p2742_p7, %p2739_p4 }
  0x6e   : > { %2747 = shalt.err (!%p2744_p8)
}
  0x6f   : > { %s2748_s16 = scalar_lea.vmem %s553_s20, 16  ;;  %s2755_s24 = scalar_lea.vmem %s553_s20, 32 }
  0x70   : > { %p2749_p11 = scmp.ne.s32.totalorder %s553_s20, %s2748_s16  ;;  %p2756_p6 = scmp.lt.s32.totalorder %s553_s20, %s553_s20 }
  0x71   : > { %p2757_p9 = scmp.lt.s32.totalorder %s2755_s24, %s2748_s16 }
  0x72   : > { %p2751_p13 = pnand %p2749_p11, %p3206_p0 }
  0x73   : > { %p2758_p5 = por %p2757_p9, %p2756_p6 }
  0x74   : > { %p2752_p1 = pneg %p2751_p13 }
  0x76   : > { %p2759_p10 = pnand %p2758_p5, %p2752_p1 }
  0x78   : > { %2762 = shalt.err (!%p2759_p10)
}
  0x79   : > { %2572 = dma.hbm_to_vmem [thread:$0]  (!%p3190_p12), %s3709_s8, 16, %s553_s20, [#allocation14]  }
  0x7a   : > { %s3020_s30 = smov [#allocation16]   ;;  %s3021_s26 = smov [#allocation4]  }
  0x7b   : > { %s576_s2 = sshll.u32 %s3020_s30, 4  ;;  %s484_s23 = sshll.u32 %s3021_s26, 4  ;;  %s577_s2 = int_to_ptr.vmem [resolvable:$true] %s576_s2  ;;  %s485_s23 = int_to_ptr.vmem [resolvable:$true] %s484_s23 }
  0x7c   : > { %s3710_s11 = sld [smem:[#allocation40_spill]] }
  0x82   : > { %s2763_s29 = scalar_lea.hbm %s3710_s11, 128 }
  0x83   : > { %p2764_p5 = scmp.ne.s32.totalorder %s3710_s11, %s2763_s29  ;;  %p2770_p3 = scmp.lt.u32.totalorder %s2763_s29, %s3710_s11 }
  0x85   : > { %p2766_p10 = pnand %p2764_p5, %p3206_p0 }
  0x87   : > { %p2767_p2 = pneg %p2766_p10 }
  0x89   : > { %p2772_p4 = pnand %p2770_p3, %p2767_p2 }
  0x8b   : > { %2775 = shalt.err (!%p2772_p4)
}
  0x8c   : > { %s2776_s20 = scalar_lea.vmem %s577_s2, 128  ;;  %p2784_p13 = scmp.lt.s32.totalorder %s577_s2, %s577_s2 }
  0x8d   : > { %p2777_p7 = scmp.ne.s32.totalorder %s577_s2, %s2776_s20  ;;  %p2785_p1 = scmp.lt.s32.totalorder %s2776_s20, %s2776_s20 }
  0x8f   : > { %p2779_p8 = pnand %p2777_p7, %p3206_p0  ;;  %p2786_p6 = por %p2785_p1, %p2784_p13 }
  0x91   : > { %p2780_p11 = pneg %p2779_p8 }
  0x93   : > { %p2787_p9 = pnand %p2786_p6, %p2780_p11 }
  0x95   : > { %2790 = shalt.err (!%p2787_p9)
}
  0x96   : > { %s3711_s18 = smov 64   ;;  %s3712_s19 = sld [smem:[#allocation35_spill]] }
  0x97   : > { %2578 = dma.hbm_to_vmem [thread:$0]  (!%p3190_p12), %s3710_s11, 128, %s577_s2, [#allocation17], %s3711_s18, %s3711_s18, %s3680_s0  }
  0x9c   : > { %s2791_s29 = scalar_lea.hbm %s3712_s19, 96 }
  0x9d   : > { %p2792_p5 = scmp.ne.s32.totalorder %s3712_s19, %s2791_s29  ;;  %p2798_p3 = scmp.lt.u32.totalorder %s2791_s29, %s3712_s19 }
  0x9f   : > { %p2794_p10 = pnand %p2792_p5, %p3206_p0 }
  0xa1   : > { %p2795_p2 = pneg %p2794_p10 }
  0xa3   : > { %p2800_p4 = pnand %p2798_p3, %p2795_p2 }
  0xa5   : > { %2803 = shalt.err (!%p2800_p4)
}
  0xa6   : > { %s2804_s21 = scalar_lea.vmem %s485_s23, 96  ;;  %p2812_p13 = scmp.lt.s32.totalorder %s485_s23, %s485_s23 }
  0xa7   : > { %p2805_p7 = scmp.ne.s32.totalorder %s485_s23, %s2804_s21  ;;  %p2813_p1 = scmp.lt.s32.totalorder %s2804_s21, %s2804_s21 }
  0xa9   : > { %p2807_p8 = pnand %p2805_p7, %p3206_p0  ;;  %p2814_p6 = por %p2813_p1, %p2812_p13 }
  0xab   : > { %p2808_p11 = pneg %p2807_p8 }
  0xad   : > { %p2815_p9 = pnand %p2814_p6, %p2808_p11 }
  0xaf   : > { %2818 = shalt.err (!%p2815_p9)
}
  0xb0   : > { %s3022_s2 = smov 32   ;;  %s3023_s30 = smov 2  }
  0xb1   : > { %2557 = dma.hbm_to_vmem [thread:$0]  (!%p3190_p12), %s3712_s19, 96, %s485_s23, [#allocation5], %s3022_s2, %s3022_s2, %s3023_s30  }
  0xb2   : > { %s3024_s29 = smov [#allocation9]   ;;  %s3025_s24 = smov [#allocation12]  }
  0xb3   : > { %s514_s16 = sshll.u32 %s3024_s29, 4  ;;  %s538_s17 = sshll.u32 %s3025_s24, 4  ;;  %s515_s16 = int_to_ptr.vmem [resolvable:$true] %s514_s16  ;;  %s539_s17 = int_to_ptr.vmem [resolvable:$true] %s538_s17 }
  0xb4   : > { %s2819_s21 = scalar_lea.hbm %s3646_s4, 16 }
  0xb5   : > { %p2820_p5 = scmp.ne.s32.totalorder %s3646_s4, %s2819_s21  ;;  %p2826_p3 = scmp.lt.u32.totalorder %s2819_s21, %s3646_s4 }
  0xb7   : > { %p2822_p10 = pnand %p2820_p5, %p3206_p0 }
  0xb9   : > { %p2823_p2 = pneg %p2822_p10 }
  0xbb   : > { %p2828_p4 = pnand %p2826_p3, %p2823_p2 }
  0xbd   : > { %2831 = shalt.err (!%p2828_p4)
}
  0xbe   : > { %s2832_s23 = scalar_lea.vmem %s515_s16, 16  ;;  %s2839_s0 = scalar_lea.vmem %s515_s16, 32 }
  0xbf   : > { %p2833_p7 = scmp.ne.s32.totalorder %s515_s16, %s2832_s23  ;;  %p2840_p13 = scmp.lt.s32.totalorder %s515_s16, %s515_s16 }
  0xc0   : > { %p2841_p1 = scmp.lt.s32.totalorder %s2839_s0, %s2832_s23 }
  0xc1   : > { %p2835_p8 = pnand %p2833_p7, %p3206_p0 }
  0xc2   : > { %p2842_p6 = por %p2841_p1, %p2840_p13 }
  0xc3   : > { %p2836_p11 = pneg %p2835_p8 }
  0xc5   : > { %p2843_p9 = pnand %p2842_p6, %p2836_p11 }
  0xc7   : > { %2846 = shalt.err (!%p2843_p9)
}
  0xc8   : > { %2563 = dma.hbm_to_vmem [thread:$0]  (!%p3190_p12), %s3646_s4, 16, %s515_s16, [#allocation8]  }
  0xc9   : > { %s2847_s2 = scalar_lea.hbm %s3649_s7, 384 }
  0xca   : > { %p2848_p5 = scmp.ne.s32.totalorder %s3649_s7, %s2847_s2  ;;  %p2854_p3 = scmp.lt.u32.totalorder %s2847_s2, %s3649_s7 }
  0xcc   : > { %p2850_p10 = pnand %p2848_p5, %p3206_p0 }
  0xce   : > { %p2851_p2 = pneg %p2850_p10 }
  0xd0   : > { %p2856_p4 = pnand %p2854_p3, %p2851_p2 }
  0xd2   : > { %2859 = shalt.err (!%p2856_p4)
}
  0xd3   : > { %s2860_s24 = scalar_lea.vmem %s539_s17, 384  ;;  %p2868_p13 = scmp.lt.s32.totalorder %s539_s17, %s539_s17 }
  0xd4   : > { %p2861_p7 = scmp.ne.s32.totalorder %s539_s17, %s2860_s24  ;;  %p2869_p1 = scmp.lt.s32.totalorder %s2860_s24, %s2860_s24 }
  0xd6   : > { %p2863_p8 = pnand %p2861_p7, %p3206_p0  ;;  %p2870_p6 = por %p2869_p1, %p2868_p13 }
  0xd8   : > { %p2864_p11 = pneg %p2863_p8 }
  0xda   : > { %p2871_p9 = pnand %p2870_p6, %p2864_p11 }
  0xdc   : > { %2874 = shalt.err (!%p2871_p9)
}
  0xdd   : > { %s3713_s16 = smov 4   ;;  %s3026_s23 = smov [#allocation15]  }
  0xde   : > { %2569 = dma.hbm_to_vmem [thread:$0]  (!%p3190_p12), %s3649_s7, 384, %s539_s17, [#allocation11], %s3711_s18, %s3711_s18, %s3713_s16  }
  0xdf   : > { %s566_s0 = sshll.u32 %s3026_s23, 4  ;;  %s3027_s6 = smov [#allocation18]   ;;  %s567_s0 = int_to_ptr.vmem [resolvable:$true] %s566_s0 }
  0xe0   : > { %s598_s8 = sshll.u32 %s3027_s6, 4  ;;  %s2875_s2 = scalar_lea.hbm %s3652_s10, 16  ;;  %s599_s8 = int_to_ptr.vmem [resolvable:$true] %s598_s8 }
  0xe1   : > { %p2876_p5 = scmp.ne.s32.totalorder %s3652_s10, %s2875_s2  ;;  %p2882_p3 = scmp.lt.u32.totalorder %s2875_s2, %s3652_s10 }
  0xe3   : > { %p2878_p10 = pnand %p2876_p5, %p3206_p0 }
  0xe5   : > { %p2879_p2 = pneg %p2878_p10 }
  0xe7   : > { %p2884_p4 = pnand %p2882_p3, %p2879_p2 }
  0xe9   : > { %2887 = shalt.err (!%p2884_p4)
}
  0xea   : > { %s2888_s17 = scalar_lea.vmem %s567_s0, 16  ;;  %s2895_s24 = scalar_lea.vmem %s567_s0, 32 }
  0xeb   : > { %p2889_p7 = scmp.ne.s32.totalorder %s567_s0, %s2888_s17  ;;  %p2896_p13 = scmp.lt.s32.totalorder %s567_s0, %s567_s0 }
  0xec   : > { %p2897_p1 = scmp.lt.s32.totalorder %s2895_s24, %s2888_s17 }
  0xed   : > { %p2891_p8 = pnand %p2889_p7, %p3206_p0 }
  0xee   : > { %p2898_p6 = por %p2897_p1, %p2896_p13 }
  0xef   : > { %p2892_p11 = pneg %p2891_p8 }
  0xf1   : > { %p2899_p9 = pnand %p2898_p6, %p2892_p11 }
  0xf3   : > { %2902 = shalt.err (!%p2899_p9)
}
  0xf4   : > { %2575 = dma.hbm_to_vmem [thread:$0]  (!%p3190_p12), %s3652_s10, 16, %s567_s0, [#allocation14]  }
  0xf5   : > { %s2903_s11 = scalar_lea.hbm %s3657_s15, 768 }
  0xf6   : > { %p2904_p5 = scmp.ne.s32.totalorder %s3657_s15, %s2903_s11  ;;  %p2910_p3 = scmp.lt.u32.totalorder %s2903_s11, %s3657_s15 }
  0xf8   : > { %p2906_p10 = pnand %p2904_p5, %p3206_p0 }
  0xfa   : > { %p2907_p2 = pneg %p2906_p10 }
  0xfc   : > { %p2912_p4 = pnand %p2910_p3, %p2907_p2 }
  0xfe   : > { %2915 = shalt.err (!%p2912_p4)
}
  0xff   : > { %s2916_s25 = scalar_lea.vmem %s599_s8, 768  ;;  %p2924_p13 = scmp.lt.s32.totalorder %s599_s8, %s599_s8 }
 0x100   : > { %p2917_p7 = scmp.ne.s32.totalorder %s599_s8, %s2916_s25  ;;  %p2925_p1 = scmp.lt.s32.totalorder %s2916_s25, %s2916_s25 }
 0x102   : > { %p2919_p8 = pnand %p2917_p7, %p3206_p0  ;;  %p2926_p6 = por %p2925_p1, %p2924_p13 }
 0x104   : > { %p2920_p11 = pneg %p2919_p8 }
 0x106   : > { %p2927_p9 = pnand %p2926_p6, %p2920_p11 }
 0x108   : > { %2930 = shalt.err (!%p2927_p9)
}
 0x109   : > { %2581 = dma.hbm_to_vmem [thread:$0]  (!%p3190_p12), %s3657_s15, 768, %s599_s8, [#allocation17], %s3711_s18, %s3711_s18, %s3713_s16  }
 0x10a   : > { %p3714_p5 = scmp.ne.s32.totalorder %s3704_s27, 0 }
 0x10b   : > { %p3715_p0 = scmp.eq.s32.totalorder (!%p3714_p5), %s3152_s1, 0 }
 0x10c   : > { %631 = sbr.rel (%p3714_p5) target bundleno = 1970 (0x7b2), region = 96 }
 0x113   : > { %2976 = dma.done.wait (%p3715_p0), [#allocation5], 96   ;;  %p3716_p10 = pmov %p3715_p0 }
 0x114   : > { %p3717_p2 = pmov %p3715_p0 }
 0x115   : > { %2978 = vsyncadd (%p3716_p10), [#allocation5], 4294967200 }
 0x116   : > { %2980 = dma.done.wait (%p3717_p2), [#allocation8], 400   ;;  %p3718_p3 = pmov %p3715_p0 }
 0x117   : > { %p3719_p4 = pmov %p3715_p0 }
 0x118   : > { %2982 = vsyncadd (%p3718_p3), [#allocation8], 4294966896 }
 0x119   : > { %2984 = dma.done.wait (%p3719_p4), [#allocation11], 400   ;;  %p3720_p12 = pmov %p3715_p0 }
 0x11a   : > { %p3721_p7 = pmov %p3715_p0 }
 0x11b   : > { %2986 = vsyncadd (%p3720_p12), [#allocation11], 4294966896 }
 0x11c   : > { %2988 = dma.done.wait (%p3721_p7), [#allocation14], 32   ;;  %p3722_p8 = pmov %p3715_p0 }
 0x11d   : > { %p3723_p11 = pmov %p3715_p0 }
 0x11e   : > { %2990 = vsyncadd (%p3722_p8), [#allocation14], 4294967264 }
 0x11f   : > { %2992 = dma.done.wait (%p3723_p11), [#allocation17], 896   ;;  %p3724_p13 = pmov %p3715_p0 }
 0x120   : > { %p718_p1 = scmp.lt.s32.totalorder %s3152_s1, 1  ;;  %v3028_v0 = vmov 0.0   ;;  %vm724_vm0 = vcmask 261120   ;;  %vm3029_vm1 = vmmov 0   ;;  %vm746_vm2 = vcmask 1041408   ;;  %s3725_s16 = sld [smem:[#allocation34_spill]] }
 0x121   : > { %2994 = vsyncadd (%p3724_p13), [#allocation17], 4294966400  ;;  %2370 = vmatprep.subr.bf16.mxu0 %v3028_v0  ;;  %2376 = vmatprep.subr.bf16.mxu1 %v3028_v0  ;;  %725 = vst.msk [vmem:[#allocation2] sm:$0xff] %vm724_vm0, %v3028_v0  ;;  %vm729_vm3 = vcmask 31744   ;;  %v742_v1 = vld [vmem:[#allocation4 + $0x2] sm:$0x3] }
 0x122   : > { %2372 = vmatprep.mubr.msk.bf16.mxu0 %vm3029_vm1, %v3028_v0  ;;  %2378 = vmatprep.mubr.msk.bf16.mxu1 %vm3029_vm1, %v3028_v0  ;;  %s719_s3 = scalar_select %p718_p1, %s3152_s1, 1  ;;  %726 = vst.msk [vmem:[#allocation3] sm:$0xff] %vm724_vm0, %v3028_v0  ;;  %v737_v2 = vld [vmem:[#allocation4] sm:$0x3]  ;;  %v748_v4 = vsel %vm746_vm2, %v742_v1, 0  ;;  %v2652_v18 = vld [vmem:[#allocation7 + $0x8] sm:$0xff]  }
 0x123   : > { %v795_v5 = vsel %vm746_vm2, %v737_v2, 0  ;;  %2371 = vmatpush3.bf16.msra.mxu0 %v748_v4  ;;  %v840_v7 = vld [vmem:[#allocation4 + $0x4] sm:$0x3]  ;;  %v2653_v19 = vld [vmem:[#allocation7] sm:$0xff]   ;;  %s3726_s20 = sld [smem:[#allocation36_spill]]  ;;  %vm901_vm4 = vcmask 130048  }
 0x124   : > { %s2317_s27 = sshll.u32 %s719_s3, 4  ;;  %2377 = vmatpush3.bf16.msra.mxu1 %v795_v5  ;;  %2382 = vmatprep.subr.bf16.mxu0 %v3028_v0  ;;  %v845_v12 = vsel %vm746_vm2, %v840_v7, 0  ;;  %v1084_v41 = vld [vmem:[%s3647_s5] sm:$0x3]  ;;  %v2654_v43 = vld [vmem:[#allocation7 + $0x10] sm:$0xff]   ;;  %v2656_v54 = vld [vmem:[#allocation12] sm:$0xff]  }
 0x125   : > { %2388 = vmatprep.subr.bf16.mxu1 %v3028_v0  ;;  %v1093_v49 = vsel %vm746_vm2, %v1084_v41, 0  ;;  %v2655_v53 = vld [vmem:[#allocation12 + $0x8] sm:$0xff]   ;;  %v2253_v4 = vld [vmem:[#allocation10] ss:$0 sm:$0xff]  ;;  %s3729_s24 = sld [smem:[#allocation41_spill]]  ;;  %s3730_s6 = sld [smem:[#allocation43_spill]] }
 0x126   : > { %s722_s8 = scalar_lea.vmem %s3725_s16, %s2317_s27  ;;  %s3727_s27 = sld [smem:[#allocation42_spill]]  ;;  %vm2060_vm5 = vcmask 16384  }
 0x127   : > { %v727_v3 = vld [vmem:[%s722_s8] sm:$0xff]  ;;  %v728_v6 = vld [vmem:[%s722_s8 + $0x8] sm:$0xff]  ;;  %s3728_s16 = sld [smem:[#allocation27_spill]]  ;;  %s3731_s11 = sld [smem:[#allocation32_spill]] }
 0x128   : > { %730 = vst.msk [vmem:[#allocation2 + $0x8] sm:$0xff] %vm729_vm3, %v727_v3  ;;  %731 = vst.msk [vmem:[#allocation2 + $0x10] sm:$0xff] %vm729_vm3, %v728_v6  ;;  %v2252_v3 = vld [vmem:[#allocation9] ss:$0 sm:$0xff]  ;;  %s2314_s28 = sshll.u32 %s3152_s1, 4  ;;  %s3732_s0 = sld [smem:[#allocation44_spill]] }
 0x129   : > { %v2245_v31 = vld [vmem:[%s3726_s20] ss:$0 sm:$0xff]  ;;  %s3030_s18 = smov [#allocation19]  }
 0x12d   : > { %s716_s20 = sand.u32 1, %s3728_s16   ;;  %p3734_p9 = scmp.ne.s32.totalorder %s3731_s11, 0 }
 0x12e   : > { %s717_s2 = scalar_lea.vmem [#allocation19], %s716_s20  ;;  %s3733_s29 = smov %s3732_s0 }
 0x12f   : > { %v738_v8 = vld [vmem:[#allocation2 + $0x7] sm:$0xff]  ;;  %v739_v10 = vld [vmem:[#allocation2 + $0xf] sm:$0xff]  ;;  %s2075_s30 = sshll.u32 %s717_s2, 4  ;;  %s3600_s3 = scalar_lea.hbm %s3732_s0, %s2314_s28  ;;  %s3602_s30 = int_to_ptr.vmem [resolvable:$true] %s2075_s30 }
 0x130   : > { %v734_v9 = vld [vmem:[#allocation2 + $0x6] sm:$0xff]  ;;  %v735_v11 = vld [vmem:[#allocation2 + $0xe] sm:$0xff]  ;;  %v740_v13 = vpack.c.bf16 %v739_v10, %v738_v8  ;;  %s2063_s1 = scalar_lea.sflag [#allocation6], %s716_s20  ;;  %s2931_s22 = scalar_lea.vmem %s3602_s30, 16 }
 0x131   : > { %v736_v14 = vpack.c.bf16 %v735_v11, %v734_v9  ;;  %v732_v15 = vld [vmem:[#allocation2 + $0x8] sm:$0xff]  ;;  %v733_v16 = vld [vmem:[#allocation2 + $0x10] sm:$0xff]  ;;  %p2932_p6 = scmp.ne.s32.totalorder %s3602_s30, %s2931_s22  ;;  %s2935_s16 = sshll.u32 %s3030_s18, 4  ;;  %s2936_s16 = int_to_ptr.vmem [resolvable:$false] %s2935_s16 }
 0x132   : > { %2373 = vmatmul.mubr.msk.bf16.vlgmr.msra.gmra.mrb[0].mxu0 %vm729_vm3, %v740_v13  ;;  %v838_v17 = vpack.c.bf16 %v733_v16, %v732_v15  ;;  %s2937_s8 = scalar_lea.vmem %s2936_s16, 32  ;;  %p2938_p10 = scmp.lt.s32.totalorder %s3602_s30, %s2936_s16 }
 0x133   : > { %2379 = vmatmul.mubr.msk.bf16.vlgmr.msra.gmra.mrb[0].mxu1 %vm729_vm3, %v736_v14  ;;  %2383 = vmatpush3.bf16.msra.mxu0 %v845_v12  ;;  %p2933_p5 = pnand %p2932_p6, %p3734_p9  ;;  %p2939_p2 = scmp.lt.s32.totalorder %s2937_s8, %s2931_s22 }
 0x134   : > { %2384 = vmatprep.mubr.msk.bf16.mxu0 %vm3029_vm1, %v3028_v0  ;;  %2394 = vmatprep.subr.bf16.mxu0 %v3028_v0 }
 0x135   : > { %2390 = vmatprep.mubr.msk.bf16.mxu1 %vm3029_vm1, %v3028_v0  ;;  %2389 = vmatpush3.bf16.msra.mxu1 %v2652_v18  ;;  %p2934_p0 = pneg %p2933_p5  ;;  %p2940_p3 = por %p2939_p2, %p2938_p10 }
 0x136   : > { %2400 = vmatprep.subr.bf16.mxu1 %v3028_v0 }
 0x137   : > { %p2941_p4 = pnand %p2940_p3, %p2934_p0 }
 0x13a   : > { %2385 = vmatmul.mubr.msk.bf16.vlgmr.msra.gmra.mrb[4].mxu0 %vm729_vm3, %v838_v17 }
 0x13b   : > { %2396 = vmatprep.mubr.msk.bf16.mxu0 %vm3029_vm1, %v3028_v0  ;;  %2395 = vmatpush3.bf16.msra.mxu0 %v2653_v19 }
 0x13c   : > { %2406 = vmatprep.subr.bf16.mxu0 %v3028_v0 }
 0x205   : > { %v784_v20 = vpop.f32.mrb[0].mxu0 }
 0x206   : > { %v831_v21 = vpop.f32.mrb[0].mxu1  ;;  %v2374_v23 = vpop.f32.mrb[1].mxu0 }
 0x207   : > { %v832_v22 = vadd.f32 %v831_v21, %v784_v20  ;;  %v2380_v24 = vpop.f32.mrb[1].mxu1  ;;  %v787_v25 = vpop.f32.mrb[2].mxu0 }
 0x208   : > { %v834_v26 = vpop.f32.mrb[2].mxu1  ;;  %v2375_v28 = vpop.f32.mrb[3].mxu0 }
 0x209   : > { %v835_v27 = vadd.f32 %v834_v26, %v787_v25  ;;  %v2381_v29 = vpop.f32.mrb[3].mxu1  ;;  %v2657_v25 = vld [vmem:[#allocation12 + $0x10] sm:$0xff]  }
 0x20d   : > { %v881_v30 = vpop.f32.mrb[4].mxu0 }
 0x20e   : > { %v888_v32 = vadd.f32 %v881_v30, %v832_v22  ;;  %v2386_v33 = vpop.f32.mrb[5].mxu0 }
 0x20f   : > { %v884_v34 = vpop.f32.mrb[6].mxu0 }
 0x210   : > { %v897_v35 = vadd.f32 %v2245_v31, %v888_v32  ;;  %v889_v36 = vadd.f32 %v884_v34, %v835_v27  ;;  %v2387_v37 = vpop.f32.mrb[7].mxu0  ;;  %v2658_v34 = vld [vmem:[%s3651_s9 + $0x10] sm:$0xff]  }
 0x211   : > { %v2661_v37 = vld [vmem:[%s3651_s9 + $0x8] sm:$0xff]  }
 0x212   : > { %v899_v38 = vmax.f32 %v897_v35, 0.0  ;;  %v898_v39 = vadd.f32 %v2245_v31, %v889_v36  ;;  %v2659_v35 = vld [vmem:[%s3651_s9] sm:$0xff]   ;;  %v2660_v36 = vld [vmem:[%s3651_s9 + $0x18] sm:$0xff]  }
 0x214   : > { %902 = vst.msk [vmem:[#allocation3 + $0x8] sm:$0xff] %vm901_vm4, %v899_v38  ;;  %v900_v40 = vmax.f32 %v898_v39, 0.0 }
 0x216   : > { %903 = vst.msk [vmem:[#allocation3 + $0x10] sm:$0xff] %vm901_vm4, %v900_v40 }
 0x21b   : > { %v909_v42 = vld [vmem:[#allocation3 + $0x7] sm:$0xff] }
 0x21c   : > { %v904_v45 = vld [vmem:[#allocation3 + $0x6] sm:$0xff] }
 0x21d   : > { %v910_v44 = vld [vmem:[#allocation3 + $0xf] sm:$0xff] }
 0x21e   : > { %v905_v46 = vld [vmem:[#allocation3 + $0xe] sm:$0xff]  ;;  %v911_v47 = vpack.c.bf16 %v910_v44, %v909_v42 }
 0x21f   : > { %v906_v48 = vpack.c.bf16 %v905_v46, %v904_v45  ;;  %v1016_v50 = vld [vmem:[#allocation3 + $0x10] sm:$0xff]  ;;  %v1015_v51 = vld [vmem:[#allocation3 + $0x8] sm:$0xff] }
 0x220   : > { %2391 = vmatmul.mubr.msk.bf16.vlgmr.msra.gmra.mrb[4].mxu1 %vm901_vm4, %v911_v47  ;;  %v1017_v52 = vpack.c.bf16 %v1016_v50, %v1015_v51 }
 0x221   : > { %2397 = vmatmul.mubr.msk.bf16.vlgmr.msra.gmra.mrb[8].mxu0 %vm901_vm4, %v906_v48  ;;  %2401 = vmatpush3.bf16.msra.mxu1 %v2654_v43 }
 0x222   : > { %2407 = vmatpush3.bf16.msra.mxu0 %v1093_v49  ;;  %2402 = vmatprep.mubr.msk.bf16.mxu1 %vm3029_vm1, %v3028_v0  ;;  %v2261_v49 = vld [vmem:[#allocation13] ss:$0 sm:$0xff] }
 0x223   : > { %2408 = vmatprep.mubr.msk.bf16.mxu0 %vm3029_vm1, %v3028_v0  ;;  %2412 = vmatprep.subr.bf16.mxu1 %v3028_v0 }
 0x224   : > { %2418 = vmatprep.subr.bf16.mxu0 %v3028_v0 }
 0x228   : > { %2403 = vmatmul.mubr.msk.bf16.vlgmr.msra.gmra.mrb[8].mxu1 %vm901_vm4, %v1017_v52 }
 0x229   : > { %2409 = vmatmul.mubr.msk.bf16.vlgmr.msra.gmra.mrb[12].mxu0 %vm729_vm3, %v838_v17  ;;  %2414 = vmatprep.mubr.msk.bf16.mxu1 %vm3029_vm1, %v3028_v0 }
 0x22a   : > { %2420 = vmatprep.mubr.msk.bf16.mxu0 %vm3029_vm1, %v3028_v0  ;;  %2413 = vmatpush3.bf16.msra.mxu1 %v2655_v53 }
 0x22b   : > { %2419 = vmatpush3.bf16.msra.mxu0 %v2656_v54  ;;  %2424 = vmatprep.subr.bf16.mxu1 %v3028_v0 }
 0x22c   : > { %2430 = vmatprep.subr.bf16.mxu0 %v3028_v0 }
 0x2f3   : > { %v958_v55 = vpop.f32.mrb[4].mxu1 }
 0x2f4   : > { %v1008_v56 = vpop.f32.mrb[8].mxu0  ;;  %v2392_v58 = vpop.f32.mrb[5].mxu1 }
 0x2f5   : > { %v1009_v57 = vadd.f32 %v1008_v56, %v958_v55  ;;  %v2398_v59 = vpop.f32.mrb[9].mxu0  ;;  %v961_v60 = vpop.f32.mrb[6].mxu1 }
 0x2f6   : > { %v1011_v61 = vpop.f32.mrb[10].mxu0  ;;  %v2393_v63 = vpop.f32.mrb[7].mxu1 }
 0x2f7   : > { %v1012_v62 = vadd.f32 %v1011_v61, %v961_v60  ;;  %v2399_v1 = vpop.f32.mrb[11].mxu0  ;;  %v2662_v60 = vld [vmem:[%s3651_s9 + $0x20] sm:$0xff]   ;;  %v2664_v61 = vld [vmem:[#allocation16] sm:$0xff]  }
 0x2fb   : > { %v1064_v2 = vpop.f32.mrb[8].mxu1 }
 0x2fc   : > { %v1129_v5 = vpop.f32.mrb[12].mxu0  ;;  %v1071_v6 = vadd.f32 %v1064_v2, %v1009_v57  ;;  %v2404_v7 = vpop.f32.mrb[9].mxu1 }
 0x2fd   : > { %v2410_v8 = vpop.f32.mrb[13].mxu0  ;;  %v1067_v9 = vpop.f32.mrb[10].mxu1  ;;  %v1130_v12 = vadd.f32 %v2253_v4, %v1129_v5 }
 0x2fe   : > { %v1132_v10 = vpop.f32.mrb[14].mxu0  ;;  %v1080_v11 = vadd.f32 %v2252_v3, %v1071_v6  ;;  %v1072_v13 = vadd.f32 %v1067_v9, %v1012_v62  ;;  %v2405_v14 = vpop.f32.mrb[11].mxu1  ;;  %v2665_v8 = vld [vmem:[%s3655_s13] sm:$0xff]   ;;  %v2666_v9 = vld [vmem:[%s3655_s13 + $0x10] sm:$0xff]  }
 0x2ff   : > { %v2411_v15 = vpop.f32.mrb[15].mxu0  ;;  %v1133_v20 = vadd.f32 %v2253_v4, %v1132_v10  ;;  %v2663_v4 = vld [vmem:[%s3651_s9 + $0x28] sm:$0xff]  }
 0x300   : > { %v1082_v16 = vmax.f32 %v1080_v11, 0.0  ;;  %v1081_v17 = vadd.f32 %v2252_v3, %v1072_v13  ;;  %v2667_v10 = vld [vmem:[%s3655_s13 + $0x8] sm:$0xff]   ;;  %v2668_v11 = vld [vmem:[%s3655_s13 + $0x18] sm:$0xff]  }
 0x302   : > { %v1136_v18 = vadd.f32 %v1130_v12, %v1082_v16  ;;  %v1083_v19 = vmax.f32 %v1081_v17, 0.0 }
 0x304   : > { %v1138_v21 = vmax.f32 %v1136_v18, 0.0  ;;  %v1137_v22 = vadd.f32 %v1133_v20, %v1083_v19 }
 0x306   : > { %1140 = vst.msk [vmem:[#allocation2 + $0x8] sm:$0xff] %vm901_vm4, %v1138_v21  ;;  %v1139_v23 = vmax.f32 %v1137_v22, 0.0 }
 0x308   : > { %1141 = vst.msk [vmem:[#allocation2 + $0x10] sm:$0xff] %vm901_vm4, %v1139_v23  ;;  %v2279_v23 = vld [vmem:[#allocation15] ss:$0 sm:$0xff] }
 0x30d   : > { %v1149_v24 = vld [vmem:[#allocation2 + $0x6] sm:$0xff] }
 0x30e   : > { %v1144_v27 = vld [vmem:[#allocation2 + $0x4] sm:$0xff] }
 0x30f   : > { %v1150_v26 = vld [vmem:[#allocation2 + $0xe] sm:$0xff] }
 0x310   : > { %v1145_v28 = vld [vmem:[#allocation2 + $0xc] sm:$0xff]  ;;  %v1151_v29 = vpack.c.bf16 %v1150_v26, %v1149_v24 }
 0x311   : > { %v1146_v30 = vpack.c.bf16 %v1145_v28, %v1144_v27  ;;  %v1143_v31 = vld [vmem:[#allocation2 + $0x10] sm:$0xff]  ;;  %v1142_v32 = vld [vmem:[#allocation2 + $0x8] sm:$0xff]  ;;  %v2280_v28 = vld [vmem:[%s3654_s12] ss:$0 sm:$0xff] }
 0x312   : > { %2415 = vmatmul.mubr.msk.bf16.vlgmr.msra.gmra.mrb[12].mxu1 %vm901_vm4, %v1151_v29  ;;  %v1255_v33 = vpack.c.bf16 %v1143_v31, %v1142_v32 }
 0x313   : > { %2421 = vmatmul.mubr.msk.bf16.vlgmr.msra.gmra.mrb[16].mxu0 %vm901_vm4, %v1146_v30  ;;  %2425 = vmatpush3.bf16.msra.mxu1 %v2657_v25 }
 0x314   : > { %2426 = vmatprep.mubr.msk.bf16.mxu1 %vm3029_vm1, %v3028_v0  ;;  %2438 = vmatprep.subr.bf16.mxu1 %v3028_v0 }
 0x315   : > { %2434 = vmatprep.mubr.msk.bf16.mxu0 %vm3029_vm1, %v3028_v0  ;;  %2431 = vmatpush3.bf16.msra.mxu0 %v2658_v34 }
 0x316   : > { %2432 = vmatprep.subr.bf16.mxu0 %v3028_v0 }
 0x319   : > { %2433 = vmatpush3.bf16.msra.mxu0 %v2660_v36 }
 0x31a   : > { %2427 = vmatmul.mubr.msk.bf16.vlgmr.msra.gmra.mrb[16].mxu1 %vm901_vm4, %v1255_v33  ;;  %2446 = vmatprep.subr.bf16.mxu0 %v3028_v0 }
 0x31b   : > { %2442 = vmatprep.mubr.msk.bf16.mxu1 %vm3029_vm1, %v3028_v0  ;;  %2439 = vmatpush3.bf16.msra.mxu1 %v2659_v35 }
 0x31c   : > { %2440 = vmatprep.subr.bf16.mxu1 %v3028_v0 }
 0x31f   : > { %2441 = vmatpush3.bf16.msra.mxu1 %v2661_v37 }
 0x320   : > { %2454 = vmatprep.subr.bf16.mxu1 %v3028_v0 }
 0x3e5   : > { %v1198_v38 = vpop.f32.mrb[12].mxu1 }
 0x3e6   : > { %v1248_v39 = vpop.f32.mrb[16].mxu0  ;;  %v2416_v41 = vpop.f32.mrb[13].mxu1 }
 0x3e7   : > { %v1249_v40 = vadd.f32 %v1248_v39, %v1198_v38  ;;  %v2422_v42 = vpop.f32.mrb[17].mxu0  ;;  %v1201_v43 = vpop.f32.mrb[14].mxu1 }
 0x3e8   : > { %v1251_v44 = vpop.f32.mrb[18].mxu0  ;;  %v2417_v46 = vpop.f32.mrb[15].mxu1 }
 0x3e9   : > { %v1252_v45 = vadd.f32 %v1251_v44, %v1201_v43  ;;  %v2423_v47 = vpop.f32.mrb[19].mxu0  ;;  %v1592_v44 = vld [vmem:[#allocation2] sm:$0xff] }
 0x3ed   : > { %v1302_v48 = vpop.f32.mrb[16].mxu1 }
 0x3ee   : > { %v1309_v50 = vadd.f32 %v1302_v48, %v1249_v40  ;;  %v2428_v51 = vpop.f32.mrb[17].mxu1 }
 0x3ef   : > { %v1305_v52 = vpop.f32.mrb[18].mxu1  ;;  %v2670_v51 = vld [vmem:[%s3655_s13 + $0x28] sm:$0xff]  }
 0x3f0   : > { %v1318_v53 = vadd.f32 %v2261_v49, %v1309_v50  ;;  %v1310_v54 = vadd.f32 %v1305_v52, %v1252_v45  ;;  %v2429_v55 = vpop.f32.mrb[19].mxu1 }
 0x3f1   : > { %v2672_v55 = vld [vmem:[#allocation18 + $0x10] sm:$0xff]  }
 0x3f2   : > { %v1320_v56 = vmax.f32 %v1318_v53, 0.0  ;;  %v1319_v57 = vadd.f32 %v2261_v49, %v1310_v54  ;;  %v2669_v49 = vld [vmem:[%s3655_s13 + $0x20] sm:$0xff]   ;;  %v2671_v54 = vld [vmem:[#allocation18] sm:$0xff]  }
 0x3f4   : > { %1322 = vst.msk [vmem:[#allocation3 + $0x8] sm:$0xff] %vm724_vm0, %v1320_v56  ;;  %v1321_v58 = vmax.f32 %v1319_v57, 0.0  ;;  %v2673_v56 = vld [vmem:[#allocation18 + $0x8] sm:$0xff]   ;;  %v2674_v57 = vld [vmem:[#allocation18 + $0x18] sm:$0xff]  }
 0x3f6   : > { %1323 = vst.msk [vmem:[#allocation3 + $0x10] sm:$0xff] %vm724_vm0, %v1321_v58 }
 0x3fb   : > { %v1331_v59 = vld [vmem:[#allocation3 + $0x6] sm:$0xff] }
 0x3fc   : > { %v1324_v63 = vld [vmem:[#allocation3 + $0x4] sm:$0xff] }
 0x3fd   : > { %v1332_v62 = vld [vmem:[#allocation3 + $0xe] sm:$0xff] }
 0x3fe   : > { %v1325_v1 = vld [vmem:[#allocation3 + $0xc] sm:$0xff]  ;;  %v1333_v2 = vpack.c.bf16 %v1332_v62, %v1331_v59 }
 0x3ff   : > { %v1326_v3 = vpack.c.bf16 %v1325_v1, %v1324_v63  ;;  %v1452_v5 = vld [vmem:[#allocation3 + $0x10] sm:$0xff]  ;;  %v1451_v6 = vld [vmem:[#allocation3 + $0x8] sm:$0xff] }
 0x400   : > { %2435 = vmatmul.mubr.msk.bf16.vlgmr.msra.gmra.mrb[20].mxu0 %vm724_vm0, %v1333_v2  ;;  %v1453_v7 = vpack.c.bf16 %v1452_v5, %v1451_v6  ;;  %v2300_v6 = vld [vmem:[%s3656_s14] ss:$0 sm:$0xff] }
 0x401   : > { %2443 = vmatmul.mubr.msk.bf16.vlgmr.msra.gmra.mrb[20].mxu1 %vm724_vm0, %v1326_v3  ;;  %2447 = vmatpush3.bf16.msra.mxu0 %v2662_v60 }
 0x402   : > { %2455 = vmatpush3.bf16.msra.mxu1 %v2664_v61  ;;  %2448 = vmatprep.subr.bf16.mxu0 %v3028_v0 }
 0x403   : > { %2450 = vmatprep.mubr.msk.bf16.mxu0 %vm3029_vm1, %v3028_v0  ;;  %2456 = vmatprep.mubr.msk.bf16.mxu1 %vm3029_vm1, %v3028_v0 }
 0x404   : > { %2468 = vmatprep.subr.bf16.mxu1 %v3028_v0 }
 0x405   : > { %2449 = vmatpush3.bf16.msra.mxu0 %v2663_v4 }
 0x406   : > { %2460 = vmatprep.subr.bf16.mxu0 %v3028_v0 }
 0x408   : > { %2451 = vmatmul.mubr.msk.bf16.vlgmr.msra.gmra.mrb[24].mxu0 %vm724_vm0, %v1453_v7 }
 0x409   : > { %2457 = vmatmul.mubr.msk.bf16.vlgmr.msra.gmra.mrb[24].mxu1 %vm901_vm4, %v1255_v33  ;;  %2464 = vmatprep.mubr.msk.bf16.mxu0 %vm3029_vm1, %v3028_v0 }
 0x40a   : > { %2472 = vmatprep.mubr.msk.bf16.mxu1 %vm3029_vm1, %v3028_v0  ;;  %2469 = vmatpush3.bf16.msra.mxu1 %v2665_v8 }
 0x40b   : > { %2461 = vmatpush3.bf16.msra.mxu0 %v2666_v9  ;;  %2470 = vmatprep.subr.bf16.mxu1 %v3028_v0 }
 0x40c   : > { %2462 = vmatprep.subr.bf16.mxu0 %v3028_v0 }
 0x40e   : > { %2471 = vmatpush3.bf16.msra.mxu1 %v2667_v10 }
 0x40f   : > { %2463 = vmatpush3.bf16.msra.mxu0 %v2668_v11  ;;  %2484 = vmatprep.subr.bf16.mxu1 %v3028_v0 }
 0x410   : > { %2476 = vmatprep.subr.bf16.mxu0 %v3028_v0 }
 0x4d3   : > { %v1388_v12 = vpop.f32.mrb[20].mxu0 }
 0x4d4   : > { %v1444_v13 = vpop.f32.mrb[20].mxu1  ;;  %v2436_v15 = vpop.f32.mrb[21].mxu0 }
 0x4d5   : > { %v1445_v14 = vadd.f32 %v1444_v13, %v1388_v12  ;;  %v2444_v16 = vpop.f32.mrb[21].mxu1  ;;  %v1391_v17 = vpop.f32.mrb[22].mxu0 }
 0x4d6   : > { %v1447_v18 = vpop.f32.mrb[22].mxu1  ;;  %v2437_v20 = vpop.f32.mrb[23].mxu0  ;;  %v1795_v16 = vld [vmem:[#allocation3] sm:$0xff] }
 0x4d7   : > { %v1448_v19 = vadd.f32 %v1447_v18, %v1391_v17  ;;  %v2445_v21 = vpop.f32.mrb[23].mxu1 }
 0x4d8   : > { %v2675_v21 = vld [vmem:[#allocation18 + $0x20] sm:$0xff]  }
 0x4db   : > { %v1508_v22 = vpop.f32.mrb[24].mxu0 }
 0x4dc   : > { %v1577_v24 = vpop.f32.mrb[24].mxu1  ;;  %v1515_v25 = vadd.f32 %v1508_v22, %v1445_v14  ;;  %v2452_v26 = vpop.f32.mrb[25].mxu0 }
 0x4dd   : > { %v2458_v27 = vpop.f32.mrb[25].mxu1  ;;  %v1511_v29 = vpop.f32.mrb[26].mxu0  ;;  %v1578_v36 = vadd.f32 %v2280_v28, %v1577_v24  ;;  %v2677_v26 = vld [vmem:[%s3727_s27] sm:$0xff]  }
 0x4de   : > { %v1580_v30 = vpop.f32.mrb[26].mxu1  ;;  %v1524_v31 = vadd.f32 %v2279_v23, %v1515_v25  ;;  %v1516_v32 = vadd.f32 %v1511_v29, %v1448_v19  ;;  %v2453_v33 = vpop.f32.mrb[27].mxu0  ;;  %v2678_v27 = vld [vmem:[%s3727_s27 + $0x8] sm:$0xff]  }
 0x4df   : > { %v2459_v34 = vpop.f32.mrb[27].mxu1  ;;  %v1581_v40 = vadd.f32 %v2280_v28, %v1580_v30 }
 0x4e0   : > { %v1526_v35 = vmax.f32 %v1524_v31, 0.0  ;;  %v1525_v37 = vadd.f32 %v2279_v23, %v1516_v32  ;;  %v2676_v23 = vld [vmem:[#allocation18 + $0x28] sm:$0xff]  }
 0x4e2   : > { %v1584_v38 = vadd.f32 %v1578_v36, %v1526_v35  ;;  %v1527_v39 = vmax.f32 %v1525_v37, 0.0 }
 0x4e4   : > { %v1586_v41 = vmax.f32 %v1584_v38, 0.0  ;;  %v1585_v42 = vadd.f32 %v1581_v40, %v1527_v39 }
 0x4e6   : > { %1588 = vst.msk [vmem:[#allocation2 + $0x8] sm:$0xff] %vm724_vm0, %v1586_v41  ;;  %v1587_v43 = vmax.f32 %v1585_v42, 0.0 }
 0x4e8   : > { %1589 = vst.msk [vmem:[#allocation2 + $0x10] sm:$0xff] %vm724_vm0, %v1587_v43 }
 0x4ed   : > { %v1590_v45 = vld [vmem:[#allocation2 + $0x8] sm:$0xff] }
 0x4ee   : > { %v1593_v46 = vpack.c.bf16 %v1590_v45, %v1592_v44  ;;  %v1598_v47 = vld [vmem:[#allocation2 + $0x4] sm:$0xff] }
 0x4ef   : > { %v1599_v48 = vld [vmem:[#allocation2 + $0xc] sm:$0xff] }
 0x4f0   : > { %2473 = vmatmul.mubr.msk.bf16.vlgmr.msra.gmra.mrb[28].mxu1 %vm724_vm0, %v1593_v46  ;;  %v1600_v50 = vpack.c.bf16 %v1599_v48, %v1598_v47  ;;  %v3556_v52 = vld [vmem:[#allocation2 + $0x10] sm:$0xff] }
 0x4f1   : > { %2488 = vmatprep.mubr.msk.bf16.mxu1 %vm3029_vm1, %v3028_v0  ;;  %v1718_v53 = vpack.c.bf16 %v3556_v52, %v1590_v45  ;;  %2485 = vmatpush3.bf16.msra.mxu1 %v2672_v55 }
 0x4f2   : > { %2465 = vmatmul.mubr.msk.bf16.vlgmr.msra.gmra.mrb[28].mxu0 %vm724_vm0, %v1600_v50  ;;  %2486 = vmatprep.subr.bf16.mxu1 %v3028_v0 }
 0x4f3   : > { %2477 = vmatpush3.bf16.msra.mxu0 %v2669_v49  ;;  %2480 = vmatprep.mubr.msk.bf16.mxu0 %vm3029_vm1, %v3028_v0  ;;  %v2000_v49 = vld [vmem:[%s3730_s6] sm:$0x1] }
 0x4f4   : > { %2478 = vmatprep.subr.bf16.mxu0 %v3028_v0 }
 0x4f5   : > { %2487 = vmatpush3.bf16.msra.mxu1 %v2674_v57 }
 0x4f6   : > { %2500 = vmatprep.subr.bf16.mxu1 %v3028_v0 }
 0x4f7   : > { %2479 = vmatpush3.bf16.msra.mxu0 %v2670_v51 }
 0x4f8   : > { %2492 = vmatprep.subr.bf16.mxu0 %v3028_v0 }
 0x4fa   : > { %2481 = vmatmul.mubr.msk.bf16.vlgmr.msra.gmra.mrb[32].mxu0 %vm724_vm0, %v1718_v53 }
 0x4fb   : > { %2496 = vmatprep.mubr.msk.bf16.mxu0 %vm3029_vm1, %v3028_v0  ;;  %2493 = vmatpush3.bf16.msra.mxu0 %v2671_v54 }
 0x4fc   : > { %2494 = vmatprep.subr.bf16.mxu0 %v3028_v0 }
 0x4ff   : > { %2495 = vmatpush3.bf16.msra.mxu0 %v2673_v56 }
 0x500   : > { %2508 = vmatprep.subr.bf16.mxu0 %v3028_v0 }
 0x5c3   : > { %v1711_v58 = vpop.f32.mrb[28].mxu1 }
 0x5c4   : > { %v2474_v59 = vpop.f32.mrb[29].mxu1 }
 0x5c5   : > { %v1655_v60 = vpop.f32.mrb[28].mxu0  ;;  %v1714_v61 = vpop.f32.mrb[30].mxu1 }
 0x5c6   : > { %v1712_v62 = vadd.f32 %v1711_v58, %v1655_v60  ;;  %v2466_v63 = vpop.f32.mrb[29].mxu0  ;;  %v2475_v1 = vpop.f32.mrb[31].mxu1 }
 0x5c7   : > { %v1658_v2 = vpop.f32.mrb[30].mxu0 }
 0x5c8   : > { %v1715_v3 = vadd.f32 %v1714_v61, %v1658_v2  ;;  %v2467_v4 = vpop.f32.mrb[31].mxu0 }
 0x5cd   : > { %v1773_v5 = vpop.f32.mrb[32].mxu0 }
 0x5ce   : > { %v1780_v7 = vadd.f32 %v1773_v5, %v1712_v62  ;;  %v2482_v8 = vpop.f32.mrb[33].mxu0 }
 0x5cf   : > { %v1776_v9 = vpop.f32.mrb[34].mxu0 }
 0x5d0   : > { %v1789_v10 = vadd.f32 %v2300_v6, %v1780_v7  ;;  %v1781_v11 = vadd.f32 %v1776_v9, %v1715_v3  ;;  %v2483_v12 = vpop.f32.mrb[35].mxu0 }
 0x5d2   : > { %v1791_v13 = vmax.f32 %v1789_v10, 0.0  ;;  %v1790_v14 = vadd.f32 %v2300_v6, %v1781_v11 }
 0x5d4   : > { %1793 = vst.msk [vmem:[#allocation3 + $0x8] sm:$0xff] %vm724_vm0, %v1791_v13  ;;  %v1792_v15 = vmax.f32 %v1790_v14, 0.0 }
 0x5d6   : > { %1794 = vst.msk [vmem:[#allocation3 + $0x10] sm:$0xff] %vm724_vm0, %v1792_v15 }
 0x5db   : > { %v1796_v17 = vld [vmem:[#allocation3 + $0x8] sm:$0xff] }
 0x5dc   : > { %v1797_v18 = vpack.c.bf16 %v1796_v17, %v1795_v16  ;;  %v1802_v19 = vld [vmem:[#allocation3 + $0x4] sm:$0xff] }
 0x5dd   : > { %v1803_v20 = vld [vmem:[#allocation3 + $0xc] sm:$0xff] }
 0x5de   : > { %2497 = vmatmul.mubr.msk.bf16.vlgmr.msra.gmra.mrb[36].mxu0 %vm724_vm0, %v1797_v18  ;;  %v1804_v22 = vpack.c.bf16 %v1803_v20, %v1802_v19  ;;  %v1921_v24 = vld [vmem:[#allocation3 + $0x10] sm:$0xff] }
 0x5df   : > { %2512 = vmatprep.mubr.msk.bf16.mxu0 %vm3029_vm1, %v3028_v0  ;;  %v1922_v25 = vpack.c.bf16 %v1921_v24, %v1796_v17  ;;  %2509 = vmatpush3.bf16.msra.mxu0 %v2677_v26 }
 0x5e0   : > { %2489 = vmatmul.mubr.msk.bf16.vlgmr.msra.gmra.mrb[32].mxu1 %vm724_vm0, %v1804_v22  ;;  %2510 = vmatprep.subr.bf16.mxu0 %v3028_v0 }
 0x5e1   : > { %2501 = vmatpush3.bf16.msra.mxu1 %v2675_v21  ;;  %2504 = vmatprep.mubr.msk.bf16.mxu1 %vm3029_vm1, %v3028_v0 }
 0x5e2   : > { %2502 = vmatprep.subr.bf16.mxu1 %v3028_v0  ;;  %v2310_v0 = vld [vmem:[%s3729_s24] ss:$0 sm:$0xff] }
 0x5e3   : > { %2511 = vmatpush3.bf16.msra.mxu0 %v2678_v27 }
 0x5e5   : > { %2503 = vmatpush3.bf16.msra.mxu1 %v2676_v23 }
 0x5e8   : > { %2505 = vmatmul.mubr.msk.bf16.vlgmr.msra.gmra.mrb[36].mxu1 %vm724_vm0, %v1922_v25 }
 0x6b1   : > { %v1914_v28 = vpop.f32.mrb[36].mxu0 }
 0x6b2   : > { %v2498_v29 = vpop.f32.mrb[37].mxu0 }
 0x6b3   : > { %v1859_v30 = vpop.f32.mrb[32].mxu1  ;;  %v1916_v31 = vpop.f32.mrb[38].mxu0 }
 0x6b4   : > { %v2490_v32 = vpop.f32.mrb[33].mxu1  ;;  %v2499_v33 = vpop.f32.mrb[39].mxu0 }
 0x6b5   : > { %v1861_v34 = vpop.f32.mrb[34].mxu1 }
 0x6b6   : > { %v1917_v35 = vadd.f32 %v1916_v31, %v1861_v34  ;;  %v2491_v36 = vpop.f32.mrb[35].mxu1 }
 0x6bb   : > { %v1977_v37 = vpop.f32.mrb[36].mxu1 }
 0x6bc   : > { %v2506_v38 = vpop.f32.mrb[37].mxu1 }
 0x6bd   : > { %v1979_v39 = vpop.f32.mrb[38].mxu1 }
 0x6be   : > { %v1983_v40 = vadd.f32 %v1979_v39, %v1917_v35  ;;  %v2507_v41 = vpop.f32.mrb[39].mxu1 }
 0x6c0   : > { %v1991_v42 = vadd.f32 %v2310_v0, %v1983_v40 }
 0x6c2   : > { %v1992_v43 = vmax.f32 %v1991_v42, 0.0 }
 0x6c4   : > { %v1993_v44 = vadd.f32 %v1992_v43, %v3556_v52 }
 0x6c6   : > { %v1994_v45 = vmax.f32 %v1993_v44, 0.0 }
 0x6c8   : > { %v1995_v46 = vpack.c.bf16 %v1994_v45, %v1994_v45 }
 0x6ca   : > { %v2002_v47 = vshrl.u32 %v1995_v46, 16 }
 0x6cc   : > { %v2004_v48 = vrot.slane %v2002_v47, 3 }
 0x6ce   : > { %2513 = vmatmul.mubr.msk.bf16.vlgmr.msra.gmra.mrb[40].mxu0 %vm724_vm0, %v2004_v48 }
 0x7a1   : > { %v2054_v50 = vpop.f32.mrb[40].mxu0 }
 0x7a2   : > { %v2055_v51 = vadd.f32 %v2054_v50, %v2000_v49  ;;  %v2514_v53 = vpop.f32.mrb[41].mxu0 }
 0x7a3   : > { %v2057_v52 = vpop.f32.mrb[42].mxu0 }
 0x7a4   : > { %v2515_v54 = vpop.f32.mrb[43].mxu0  ;;  %2061 = vst.msk [vmem:[%s717_s2] sm:$0x1] %vm2060_vm5, %v2055_v51 }
 0x7a5   : > { %2944 = shalt.err (!%p2941_p4)
}
 0x7a6   : > { %s2945_s17 = scalar_lea.hbm %s3600_s3, 16  ;;  %s2949_s21 = scalar_lea.hbm %s3733_s29, 32 }
 0x7a7   : > { %p2946_p12 = scmp.ne.s32.totalorder %s3600_s3, %s2945_s17  ;;  %p2950_p11 = scmp.lt.u32.totalorder %s3600_s3, %s3733_s29 }
 0x7a8   : > { %p2951_p13 = scmp.lt.u32.totalorder %s2949_s21, %s2945_s17  ;;  %p2953_p6 = scmp.lt.u32.totalorder %s2945_s17, %s3600_s3 }
 0x7a9   : > { %p2947_p7 = pnand %p2946_p12, %p3734_p9 }
 0x7aa   : > { %p2952_p1 = por %p2951_p13, %p2950_p11 }
 0x7ab   : > { %p2948_p8 = pneg %p2947_p7 }
 0x7ac   : > { %p2954_p5 = por %p2953_p6, %p2952_p1 }
 0x7ae   : > { %p2955_p0 = pnand %p2954_p5, %p2948_p8 }
 0x7b0   : > { %2958 = shalt.err (!%p2955_p0)
}
 0x7b1   : > { %2552 = dma.vmem_to_hbm [thread:$0]  (%p3734_p9), %s3602_s30, 16, %s3600_s3, %s2063_s1  }
 0x7b2 PF: > { %s3735_s28 = sld [smem:[#allocation29_spill]]  ;;  %s3736_s2 = sld [smem:[#allocation26_spill]] }
 0x7b3   : > { %s3737_s26 = sld [smem:[#allocation33_spill]] }
 0x7b8   : > { %p2604_p10 = scmp.ge.s32.totalorder %s3735_s28, 2  ;;  %s2087_s25 = sand.u32 1, %s3736_s2  }
 0x7b9   : > { %p3738_p2 = scmp.ne.s32.totalorder %s3737_s26, 0  ;;  %s2088_s0 = scalar_lea.sflag [#allocation6], %s2087_s25 }
 0x7bb   : > { %p2583_p3 = pnand %p2604_p10, %p3738_p2 }
 0x7bd   : > { %2996 = dma.done.wait (!%p2583_p3), %s2088_s0, 16  }
 0x7be   : > { %2998 = vsyncadd (!%p2583_p3), %s2088_s0, 4294967280  ;;  %s3739_s21 = sld [smem:[#allocation30_spill]]  ;;  %s3740_s0 = sld [smem:[#allocation27_spill]] }
 0x7bf   : > { %s3741_s30 = sld [smem:[#allocation28_spill]]  ;;  %s3742_s20 = sld [smem:[#allocation31_spill]] }
 0x7c4   : > { %p34_p4 = scmp.ge.s32.totalorder %s3739_s21, 4  }
 0x7c6   :  { %36 = sbr.rel (!%p34_p4) target bundleno = 20 (0x14), region = 180 }
 0x7cd   :  { %2092 = vsyncpa [#allocation5], 1 }
 0x7ce   :  { %2094 = vsyncpa [#allocation5 + $0x1], 1 }
 0x7cf   :  { %2095 = vsyncpa [#allocation8], 1 }
 0x7d0   :  { %2096 = vsyncpa [#allocation11], 1 }
 0x7d1   :  { %2097 = vsyncpa [#allocation14], 1 }
 0x7d2   :  { %2098 = vsyncpa [#allocation17], 1 }
 0x7d3   :  { %2099 = vsyncpa [#allocation6], 1 }
 0x7d4   :  { %2101 = vsyncpa [#allocation6 + $0x1], 1 }

</bundles_post_ra>
